<compile_context>
chip_gen: v5e
topology: v5e:2x2
jax: 0.10.0
libtpu: 0.0.40
codegen_flags: <defaults>
</compile_context>

<pallas_src>
import math

import jax
import jax.numpy as jnp
from jax.experimental import pallas as pl
from jax.experimental.pallas import tpu as pltpu  # noqa: F401  (TPU backend)

# ----------------------- tiny BERT config (synthetic) -----------------------
VOCAB = 100
HIDDEN = 32
N_HEADS = 2
HEAD_DIM = HIDDEN // N_HEADS
N_LAYERS = 2
INTERMEDIATE = 64
MAX_POS = 16
NUM_LABELS = 3
LN_EPS = 1e-12


# ------------------------------ fused kernel --------------------------------
def _layernorm(x, g, b):
    x = x.astype(jnp.float32)
    mu = jnp.mean(x, axis=-1, keepdims=True)
    var = jnp.mean(jnp.square(x - mu), axis=-1, keepdims=True)
    return (x - mu) * jax.lax.rsqrt(var + LN_EPS) * g + b


def _bert_fused_kernel(
    word_ref, pos_type_ref, mask_ref,
    emb_g_ref, emb_b_ref,
    wqkv_ref, bqkv_ref, wo_ref, bo_ref,
    ln1_g_ref, ln1_b_ref,
    w1_ref, b1_ref, w2_ref, b2_ref,
    ln2_g_ref, ln2_b_ref,
    pool_w_ref, pool_b_ref, cls_w_ref, cls_b_ref,
    o_ref,
):
    B, S, H = word_ref.shape
    BS = B * S
    n_layers = wqkv_ref.shape[0]
    scale = 1.0 / math.sqrt(HEAD_DIM)

    # Embeddings: word + (position + token_type), then LayerNorm — all in VMEM.
    x = word_ref[...] + pos_type_ref[...][None, :, :]                # [B, S, H]
    h = _layernorm(x.reshape(BS, H), emb_g_ref[...], emb_b_ref[...])  # [BS, H]

    # Additive attention mask, computed/loaded ONCE (broadcast over heads/queries).
    mask_add = (1.0 - mask_ref[...].astype(jnp.float32)) * -10000.0   # [B, S]
    mask_add = mask_add[:, None, :]                                   # [B, 1, S]

    for l in range(n_layers):                      # unrolled at trace time
        # Fused QKV projection: one [BS, H] x [H, 3H] MXU matmul (3 launches -> 0).
        qkv = jnp.dot(h, wqkv_ref[l], preferred_element_type=jnp.float32)
        qkv = (qkv + bqkv_ref[l]).reshape(B, S, 3 * H)                # [B, S, 3H]

        head_ctx = []
        for hh in range(N_HEADS):                  # in-kernel head slicing
            q = qkv[:, :, hh * HEAD_DIM:(hh + 1) * HEAD_DIM]
            k = qkv[:, :, H + hh * HEAD_DIM:H + (hh + 1) * HEAD_DIM]
            v = qkv[:, :, 2 * H + hh * HEAD_DIM:2 * H + (hh + 1) * HEAD_DIM]
            s = jnp.einsum("bqd,bkd->bqk", q, k,
                           preferred_element_type=jnp.float32)        # no k.T
            s = s * scale + mask_add
            m = jnp.max(s, axis=-1, keepdims=True)
            p = jnp.exp(s - m)
            denom = jnp.sum(p, axis=-1, keepdims=True)
            p = p * pl.reciprocal(denom, approx=True)                 # EUP divide
            head_ctx.append(jnp.einsum("bqk,bkd->bqd", p, v,
                                       preferred_element_type=jnp.float32))
        ctx = jnp.concatenate(head_ctx, axis=-1).reshape(BS, H)

        # Output projection + residual + LayerNorm epilogue (no extra launches).
        attn_out = jnp.dot(ctx, wo_ref[l],
                           preferred_element_type=jnp.float32) + bo_ref[l]
        h = _layernorm(attn_out + h, ln1_g_ref[l], ln1_b_ref[l])

        # FFN: w1 -> GELU -> w2 -> residual + LayerNorm epilogue.
        ffn = jnp.dot(h, w1_ref[l],
                      preferred_element_type=jnp.float32) + b1_ref[l]
        # TODO(synk): HF BERT uses exact erf-GELU; tanh approximation used here
        # to guarantee Mosaic lowering (difference is ~1e-3 relative).
        ffn = jax.nn.gelu(ffn, approximate=True)
        ffn = jnp.dot(ffn, w2_ref[l],
                      preferred_element_type=jnp.float32) + b2_ref[l]
        h = _layernorm(ffn + h, ln2_g_ref[l], ln2_b_ref[l])

    # Pooler (CLS token -> dense -> tanh) + classifier, still in-kernel.
    cls = jnp.concatenate([h[b * S:b * S + 1, :] for b in range(B)], axis=0)
    pooled = jnp.tanh(
        jnp.dot(cls, pool_w_ref[...], preferred_element_type=jnp.float32)
        + pool_b_ref[...])
    # Dropout(p=0.1): identity in eval/inference mode.
    logits = (jnp.dot(pooled, cls_w_ref[...],
                      preferred_element_type=jnp.float32) + cls_b_ref[...])
    o_ref[...] = logits.astype(o_ref.dtype)


def _full_spec(arr):
    shape = tuple(arr.shape)
    return pl.BlockSpec(shape, lambda *_: (0,) * len(shape))


# --------------------------- parameters (synthetic) --------------------------
def init_params(seed=1234):
    key = jax.random.PRNGKey(seed)

    def nxt():
        nonlocal key
        key, sub = jax.random.split(key)
        return sub

    def dense(k_in, k_out):
        return (0.02 * jax.random.normal(nxt(), (k_in, k_out), jnp.float32),
                jnp.zeros((k_out,), jnp.float32))

    params = {
        "word_emb": 0.02 * jax.random.normal(nxt(), (VOCAB, HIDDEN), jnp.float32),
        "pos_emb": 0.02 * jax.random.normal(nxt(), (MAX_POS, HIDDEN), jnp.float32),
        "type_emb": 0.02 * jax.random.normal(nxt(), (2, HIDDEN), jnp.float32),
        "emb_ln_g": jnp.ones((HIDDEN,), jnp.float32),
        "emb_ln_b": jnp.zeros((HIDDEN,), jnp.float32),
        "layers": [],
    }
    for _ in range(N_LAYERS):
        wq, bq = dense(HIDDEN, HIDDEN)
        wk, bk = dense(HIDDEN, HIDDEN)
        wv, bv = dense(HIDDEN, HIDDEN)
        wo, bo = dense(HIDDEN, HIDDEN)
        w1, b1 = dense(HIDDEN, INTERMEDIATE)
        w2, b2 = dense(INTERMEDIATE, HIDDEN)
        params["layers"].append({
            "wq": wq, "bq": bq, "wk": wk, "bk": bk, "wv": wv, "bv": bv,
            "wo": wo, "bo": bo,
            "ln1_g": jnp.ones((HIDDEN,), jnp.float32),
            "ln1_b": jnp.zeros((HIDDEN,), jnp.float32),
            "w1": w1, "b1": b1, "w2": w2, "b2": b2,
            "ln2_g": jnp.ones((HIDDEN,), jnp.float32),
            "ln2_b": jnp.zeros((HIDDEN,), jnp.float32),
        })
    params["pool_w"], params["pool_b"] = dense(HIDDEN, HIDDEN)
    params["cls_w"], params["cls_b"] = dense(HIDDEN, NUM_LABELS)
    return params


def pack_params(p):
    """One-time packing: concat Q|K|V, stack per-layer weights on a layer axis."""
    layers = p["layers"]

    def stack(key):
        return jnp.stack([ly[key] for ly in layers])

    def stack_row(key):
        return jnp.stack([ly[key][None, :] for ly in layers])

    return {
        "word_emb": p["word_emb"],
        # position + token_type(==0) embeddings folded into one table.
        "pos_type": p["pos_emb"] + p["type_emb"][0][None, :],
        "emb_ln_g": p["emb_ln_g"][None, :],
        "emb_ln_b": p["emb_ln_b"][None, :],
        "wqkv": jnp.stack([jnp.concatenate([ly["wq"], ly["wk"], ly["wv"]], axis=1)
                           for ly in layers]),
        "bqkv": jnp.stack([jnp.concatenate([ly["bq"], ly["bk"], ly["bv"]])[None, :]
                           for ly in layers]),
        "wo": stack("wo"), "bo": stack_row("bo"),
        "ln1_g": stack_row("ln1_g"), "ln1_b": stack_row("ln1_b"),
        "w1": stack("w1"), "b1": stack_row("b1"),
        "w2": stack("w2"), "b2": stack_row("b2"),
        "ln2_g": stack_row("ln2_g"), "ln2_b": stack_row("ln2_b"),
        "pool_w": p["pool_w"], "pool_b": p["pool_b"][None, :],
        "cls_w": p["cls_w"], "cls_b": p["cls_b"][None, :],
    }


# ------------------------------- forward pass -------------------------------
def bert_multiclassifier_forward(packed, input_ids, attention_mask):
    B, S = input_ids.shape
    # Embedding-table gather stays as XLA glue (data-dependent row gather).
    word = jnp.take(packed["word_emb"], input_ids, axis=0)        # [B, S, H]
    pos_type = packed["pos_type"][:S]                             # [S, H]

    operands = (
        word, pos_type, attention_mask.astype(jnp.int32),
        packed["emb_ln_g"], packed["emb_ln_b"],
        packed["wqkv"], packed["bqkv"], packed["wo"], packed["bo"],
        packed["ln1_g"], packed["ln1_b"],
        packed["w1"], packed["b1"], packed["w2"], packed["b2"],
        packed["ln2_g"], packed["ln2_b"],
        packed["pool_w"], packed["pool_b"], packed["cls_w"], packed["cls_b"],
    )
    return pl.pallas_call(
        _bert_fused_kernel,
        out_shape=jax.ShapeDtypeStruct((B, NUM_LABELS), jnp.float32),
        in_specs=[_full_spec(a) for a in operands],
        out_specs=pl.BlockSpec((B, NUM_LABELS), lambda *_: (0, 0)),
    )(*operands)


# ----------------------------------- main ------------------------------------
if __name__ == "__main__":
    B, S = 2, 8
    key = jax.random.PRNGKey(0)
    k_ids, k_mask = jax.random.split(key)
    input_ids = jax.random.randint(k_ids, (B, S), 0, VOCAB, dtype=jnp.int32)
    # last two tokens of the second sequence are padding
    attention_mask = jnp.ones((B, S), jnp.int32).at[1, -2:].set(0)

    params = init_params(seed=1234)
    packed = pack_params(params)

    fwd = jax.jit(bert_multiclassifier_forward)
    logits = jax.block_until_ready(fwd(packed, input_ids, attention_mask))
    assert logits.shape == (B, NUM_LABELS) and logits.dtype == jnp.float32
    print("KERNEL_OK")
</pallas_src>

<mosaic_0001>
module attributes {stable_mosaic.version = 11 : i64} {
  func.func @_bert_fused_kernel(%arg0: memref<2x8x32xf32, #tpu.memory_space<vmem>>, %arg1: memref<8x32xf32, #tpu.memory_space<vmem>>, %arg2: memref<2x8xi32, #tpu.memory_space<vmem>>, %arg3: memref<1x32xf32, #tpu.memory_space<vmem>>, %arg4: memref<1x32xf32, #tpu.memory_space<vmem>>, %arg5: memref<2x32x96xf32, #tpu.memory_space<vmem>>, %arg6: memref<2x1x96xf32, #tpu.memory_space<vmem>>, %arg7: memref<2x32x32xf32, #tpu.memory_space<vmem>>, %arg8: memref<2x1x32xf32, #tpu.memory_space<vmem>>, %arg9: memref<2x1x32xf32, #tpu.memory_space<vmem>>, %arg10: memref<2x1x32xf32, #tpu.memory_space<vmem>>, %arg11: memref<2x32x64xf32, #tpu.memory_space<vmem>>, %arg12: memref<2x1x64xf32, #tpu.memory_space<vmem>>, %arg13: memref<2x64x32xf32, #tpu.memory_space<vmem>>, %arg14: memref<2x1x32xf32, #tpu.memory_space<vmem>>, %arg15: memref<2x1x32xf32, #tpu.memory_space<vmem>>, %arg16: memref<2x1x32xf32, #tpu.memory_space<vmem>>, %arg17: memref<32x32xf32, #tpu.memory_space<vmem>>, %arg18: memref<1x32xf32, #tpu.memory_space<vmem>>, %arg19: memref<32x3xf32, #tpu.memory_space<vmem>>, %arg20: memref<1x3xf32, #tpu.memory_space<vmem>>, %arg21: memref<2x3xf32, #tpu.memory_space<vmem>>) attributes {dimension_semantics = [], scalar_prefetch = 0 : i64, scratch_operands = 0 : i64, tpu.core_type = #tpu.core_type<tc>} {
    %c0 = arith.constant 0 : index
    %c0_0 = arith.constant 0 : index
    %c0_1 = arith.constant 0 : index
    %0 = vector.load %arg0[%c0, %c0_0, %c0_1] : memref<2x8x32xf32, #tpu.memory_space<vmem>>, vector<2x8x32xf32>
    %c0_2 = arith.constant 0 : index
    %c0_3 = arith.constant 0 : index
    %1 = vector.load %arg1[%c0_2, %c0_3] : memref<8x32xf32, #tpu.memory_space<vmem>>, vector<8x32xf32>
    %2 = vector.shape_cast %1 : vector<8x32xf32> to vector<1x8x32xf32>
    %3 = vector.broadcast %2 : vector<1x8x32xf32> to vector<2x8x32xf32>
    %4 = arith.addf %0, %3 : vector<2x8x32xf32>
    %5 = vector.shape_cast %4 : vector<2x8x32xf32> to vector<16x32xf32>
    %c0_4 = arith.constant 0 : index
    %c0_5 = arith.constant 0 : index
    %6 = vector.load %arg3[%c0_4, %c0_5] : memref<1x32xf32, #tpu.memory_space<vmem>>, vector<1x32xf32>
    %c0_6 = arith.constant 0 : index
    %c0_7 = arith.constant 0 : index
    %7 = vector.load %arg4[%c0_6, %c0_7] : memref<1x32xf32, #tpu.memory_space<vmem>>, vector<1x32xf32>
    %cst = arith.constant dense<0.000000e+00> : vector<16xf32>
    %8 = vector.multi_reduction <add>, %5, %cst [1] : vector<16x32xf32> to vector<16xf32>
    %9 = vector.shape_cast %8 : vector<16xf32> to vector<16x1xf32>
    %cst_8 = arith.constant 3.200000e+01 : f32
    %10 = vector.broadcast %cst_8 : f32 to vector<16x1xf32>
    %11 = arith.divf %9, %10 : vector<16x1xf32>
    %12 = vector.broadcast %11 : vector<16x1xf32> to vector<16x32xf32>
    %13 = arith.subf %5, %12 : vector<16x32xf32>
    %14 = arith.mulf %13, %13 : vector<16x32xf32>
    %cst_9 = arith.constant dense<0.000000e+00> : vector<16xf32>
    %15 = vector.multi_reduction <add>, %14, %cst_9 [1] : vector<16x32xf32> to vector<16xf32>
    %16 = vector.shape_cast %15 : vector<16xf32> to vector<16x1xf32>
    %cst_10 = arith.constant 3.200000e+01 : f32
    %17 = vector.broadcast %cst_10 : f32 to vector<16x1xf32>
    %18 = arith.divf %16, %17 : vector<16x1xf32>
    %19 = vector.broadcast %11 : vector<16x1xf32> to vector<16x32xf32>
    %20 = arith.subf %5, %19 : vector<16x32xf32>
    %cst_11 = arith.constant 9.99999996E-13 : f32
    %21 = vector.broadcast %cst_11 : f32 to vector<16x1xf32>
    %22 = arith.addf %18, %21 : vector<16x1xf32>
    %23 = math.rsqrt %22 : vector<16x1xf32>
    %24 = vector.broadcast %23 : vector<16x1xf32> to vector<16x32xf32>
    %25 = arith.mulf %20, %24 : vector<16x32xf32>
    %26 = vector.broadcast %6 : vector<1x32xf32> to vector<16x32xf32>
    %27 = arith.mulf %25, %26 : vector<16x32xf32>
    %28 = vector.broadcast %7 : vector<1x32xf32> to vector<16x32xf32>
    %29 = arith.addf %27, %28 : vector<16x32xf32>
    %c0_12 = arith.constant 0 : index
    %c0_13 = arith.constant 0 : index
    %30 = vector.load %arg2[%c0_12, %c0_13] : memref<2x8xi32, #tpu.memory_space<vmem>>, vector<2x8xi32>
    %31 = arith.sitofp %30 : vector<2x8xi32> to vector<2x8xf32>
    %cst_14 = arith.constant 1.000000e+00 : f32
    %32 = vector.broadcast %cst_14 : f32 to vector<2x8xf32>
    %33 = arith.subf %32, %31 : vector<2x8xf32>
    %cst_15 = arith.constant -1.000000e+04 : f32
    %34 = vector.broadcast %cst_15 : f32 to vector<2x8xf32>
    %35 = arith.mulf %33, %34 : vector<2x8xf32>
    %36 = vector.shape_cast %35 : vector<2x8xf32> to vector<2x1x8xf32>
    %c0_16 = arith.constant 0 : index
    %c0_17 = arith.constant 0 : index
    %c0_18 = arith.constant 0 : index
    %37 = vector.load %arg5[%c0_16, %c0_17, %c0_18] : memref<2x32x96xf32, #tpu.memory_space<vmem>>, vector<1x32x96xf32>
    %38 = vector.shape_cast %37 : vector<1x32x96xf32> to vector<32x96xf32>
    %cst_19 = arith.constant dense<0.000000e+00> : vector<16x96xf32>
    %39 = tpu.matmul %29, %38, %cst_19 {dimension_numbers = #tpu.dot_dimension_numbers<[1], [0], [0], [1], [0, 0, 1, 1], [], []>} : vector<16x32xf32>, vector<32x96xf32>, vector<16x96xf32> -> vector<16x96xf32>
    %c0_20 = arith.constant 0 : index
    %c0_21 = arith.constant 0 : index
    %c0_22 = arith.constant 0 : index
    %40 = vector.load %arg6[%c0_20, %c0_21, %c0_22] : memref<2x1x96xf32, #tpu.memory_space<vmem>>, vector<1x1x96xf32>
    %41 = vector.shape_cast %40 : vector<1x1x96xf32> to vector<1x96xf32>
    %42 = vector.broadcast %41 : vector<1x96xf32> to vector<16x96xf32>
    %43 = arith.addf %39, %42 : vector<16x96xf32>
    %44 = vector.shape_cast %43 : vector<16x96xf32> to vector<2x8x96xf32>
    %45 = vector.extract_strided_slice %44 {offsets = [0, 0, 0], sizes = [2, 8, 16], strides = [1, 1, 1]} : vector<2x8x96xf32> to vector<2x8x16xf32>
    %46 = vector.extract_strided_slice %44 {offsets = [0, 0, 32], sizes = [2, 8, 16], strides = [1, 1, 1]} : vector<2x8x96xf32> to vector<2x8x16xf32>
    %47 = vector.extract_strided_slice %44 {offsets = [0, 0, 64], sizes = [2, 8, 16], strides = [1, 1, 1]} : vector<2x8x96xf32> to vector<2x8x16xf32>
    "tpu.trace_start"() <{level = 10 : i32, message = "bqd,bkd->bqk"}> : () -> ()
    %cst_23 = arith.constant dense<0.000000e+00> : vector<2x8x8xf32>
    %48 = tpu.matmul %45, %46, %cst_23 {dimension_numbers = #tpu.dot_dimension_numbers<[2], [2], [1], [1], [0, 0, 0, 1, 1, 1], [0], [0]>} : vector<2x8x16xf32>, vector<2x8x16xf32>, vector<2x8x8xf32> -> vector<2x8x8xf32>
    "tpu.trace_stop"() : () -> ()
    %cst_24 = arith.constant 2.500000e-01 : f32
    %49 = vector.broadcast %cst_24 : f32 to vector<2x8x8xf32>
    %50 = arith.mulf %48, %49 : vector<2x8x8xf32>
    %51 = vector.broadcast %36 : vector<2x1x8xf32> to vector<2x8x8xf32>
    %52 = arith.addf %50, %51 : vector<2x8x8xf32>
    %cst_25 = arith.constant dense<0xFF800000> : vector<2x8xf32>
    %53 = vector.multi_reduction <maximumf>, %52, %cst_25 [2] : vector<2x8x8xf32> to vector<2x8xf32>
    %54 = vector.shape_cast %53 : vector<2x8xf32> to vector<2x8x1xf32>
    %55 = vector.broadcast %54 : vector<2x8x1xf32> to vector<2x8x8xf32>
    %56 = arith.subf %52, %55 : vector<2x8x8xf32>
    %57 = math.exp %56 : vector<2x8x8xf32>
    %cst_26 = arith.constant dense<0.000000e+00> : vector<2x8xf32>
    %58 = vector.multi_reduction <add>, %57, %cst_26 [2] : vector<2x8x8xf32> to vector<2x8xf32>
    %59 = vector.shape_cast %58 : vector<2x8xf32> to vector<2x8x1xf32>
    %60 = tpu.reciprocal %59 {approx = true} : vector<2x8x1xf32> -> vector<2x8x1xf32>
    %61 = vector.broadcast %60 : vector<2x8x1xf32> to vector<2x8x8xf32>
    %62 = arith.mulf %57, %61 : vector<2x8x8xf32>
    "tpu.trace_start"() <{level = 10 : i32, message = "bqk,bkd->bqd"}> : () -> ()
    %cst_27 = arith.constant dense<0.000000e+00> : vector<2x8x16xf32>
    %63 = tpu.matmul %62, %47, %cst_27 {dimension_numbers = #tpu.dot_dimension_numbers<[2], [1], [1], [2], [0, 0, 0, 1, 1, 2], [0], [0]>} : vector<2x8x8xf32>, vector<2x8x16xf32>, vector<2x8x16xf32> -> vector<2x8x16xf32>
    "tpu.trace_stop"() : () -> ()
    %64 = vector.extract_strided_slice %44 {offsets = [0, 0, 16], sizes = [2, 8, 16], strides = [1, 1, 1]} : vector<2x8x96xf32> to vector<2x8x16xf32>
    %65 = vector.extract_strided_slice %44 {offsets = [0, 0, 48], sizes = [2, 8, 16], strides = [1, 1, 1]} : vector<2x8x96xf32> to vector<2x8x16xf32>
    %66 = vector.extract_strided_slice %44 {offsets = [0, 0, 80], sizes = [2, 8, 16], strides = [1, 1, 1]} : vector<2x8x96xf32> to vector<2x8x16xf32>
    "tpu.trace_start"() <{level = 10 : i32, message = "bqd,bkd->bqk"}> : () -> ()
    %cst_28 = arith.constant dense<0.000000e+00> : vector<2x8x8xf32>
    %67 = tpu.matmul %64, %65, %cst_28 {dimension_numbers = #tpu.dot_dimension_numbers<[2], [2], [1], [1], [0, 0, 0, 1, 1, 1], [0], [0]>} : vector<2x8x16xf32>, vector<2x8x16xf32>, vector<2x8x8xf32> -> vector<2x8x8xf32>
    "tpu.trace_stop"() : () -> ()
    %cst_29 = arith.constant 2.500000e-01 : f32
    %68 = vector.broadcast %cst_29 : f32 to vector<2x8x8xf32>
    %69 = arith.mulf %67, %68 : vector<2x8x8xf32>
    %70 = vector.broadcast %36 : vector<2x1x8xf32> to vector<2x8x8xf32>
    %71 = arith.addf %69, %70 : vector<2x8x8xf32>
    %cst_30 = arith.constant dense<0xFF800000> : vector<2x8xf32>
    %72 = vector.multi_reduction <maximumf>, %71, %cst_30 [2] : vector<2x8x8xf32> to vector<2x8xf32>
    %73 = vector.shape_cast %72 : vector<2x8xf32> to vector<2x8x1xf32>
    %74 = vector.broadcast %73 : vector<2x8x1xf32> to vector<2x8x8xf32>
    %75 = arith.subf %71, %74 : vector<2x8x8xf32>
    %76 = math.exp %75 : vector<2x8x8xf32>
    %cst_31 = arith.constant dense<0.000000e+00> : vector<2x8xf32>
    %77 = vector.multi_reduction <add>, %76, %cst_31 [2] : vector<2x8x8xf32> to vector<2x8xf32>
    %78 = vector.shape_cast %77 : vector<2x8xf32> to vector<2x8x1xf32>
    %79 = tpu.reciprocal %78 {approx = true} : vector<2x8x1xf32> -> vector<2x8x1xf32>
    %80 = vector.broadcast %79 : vector<2x8x1xf32> to vector<2x8x8xf32>
    %81 = arith.mulf %76, %80 : vector<2x8x8xf32>
    "tpu.trace_start"() <{level = 10 : i32, message = "bqk,bkd->bqd"}> : () -> ()
    %cst_32 = arith.constant dense<0.000000e+00> : vector<2x8x16xf32>
    %82 = tpu.matmul %81, %66, %cst_32 {dimension_numbers = #tpu.dot_dimension_numbers<[2], [1], [1], [2], [0, 0, 0, 1, 1, 2], [0], [0]>} : vector<2x8x8xf32>, vector<2x8x16xf32>, vector<2x8x16xf32> -> vector<2x8x16xf32>
    "tpu.trace_stop"() : () -> ()
    %83 = tpu.concatenate %63, %82 in 2 : vector<2x8x16xf32>, vector<2x8x16xf32> -> vector<2x8x32xf32>
    %84 = vector.shape_cast %83 : vector<2x8x32xf32> to vector<16x32xf32>
    %c0_33 = arith.constant 0 : index
    %c0_34 = arith.constant 0 : index
    %c0_35 = arith.constant 0 : index
    %85 = vector.load %arg7[%c0_33, %c0_34, %c0_35] : memref<2x32x32xf32, #tpu.memory_space<vmem>>, vector<1x32x32xf32>
    %86 = vector.shape_cast %85 : vector<1x32x32xf32> to vector<32x32xf32>
    %cst_36 = arith.constant dense<0.000000e+00> : vector<16x32xf32>
    %87 = tpu.matmul %84, %86, %cst_36 {dimension_numbers = #tpu.dot_dimension_numbers<[1], [0], [0], [1], [0, 0, 1, 1], [], []>} : vector<16x32xf32>, vector<32x32xf32>, vector<16x32xf32> -> vector<16x32xf32>
    %c0_37 = arith.constant 0 : index
    %c0_38 = arith.constant 0 : index
    %c0_39 = arith.constant 0 : index
    %88 = vector.load %arg8[%c0_37, %c0_38, %c0_39] : memref<2x1x32xf32, #tpu.memory_space<vmem>>, vector<1x1x32xf32>
    %89 = vector.shape_cast %88 : vector<1x1x32xf32> to vector<1x32xf32>
    %90 = vector.broadcast %89 : vector<1x32xf32> to vector<16x32xf32>
    %91 = arith.addf %87, %90 : vector<16x32xf32>
    %92 = arith.addf %91, %29 : vector<16x32xf32>
    %c0_40 = arith.constant 0 : index
    %c0_41 = arith.constant 0 : index
    %c0_42 = arith.constant 0 : index
    %93 = vector.load %arg9[%c0_40, %c0_41, %c0_42] : memref<2x1x32xf32, #tpu.memory_space<vmem>>, vector<1x1x32xf32>
    %94 = vector.shape_cast %93 : vector<1x1x32xf32> to vector<1x32xf32>
    %c0_43 = arith.constant 0 : index
    %c0_44 = arith.constant 0 : index
    %c0_45 = arith.constant 0 : index
    %95 = vector.load %arg10[%c0_43, %c0_44, %c0_45] : memref<2x1x32xf32, #tpu.memory_space<vmem>>, vector<1x1x32xf32>
    %96 = vector.shape_cast %95 : vector<1x1x32xf32> to vector<1x32xf32>
    %cst_46 = arith.constant dense<0.000000e+00> : vector<16xf32>
    %97 = vector.multi_reduction <add>, %92, %cst_46 [1] : vector<16x32xf32> to vector<16xf32>
    %98 = vector.shape_cast %97 : vector<16xf32> to vector<16x1xf32>
    %cst_47 = arith.constant 3.200000e+01 : f32
    %99 = vector.broadcast %cst_47 : f32 to vector<16x1xf32>
    %100 = arith.divf %98, %99 : vector<16x1xf32>
    %101 = vector.broadcast %100 : vector<16x1xf32> to vector<16x32xf32>
    %102 = arith.subf %92, %101 : vector<16x32xf32>
    %103 = arith.mulf %102, %102 : vector<16x32xf32>
    %cst_48 = arith.constant dense<0.000000e+00> : vector<16xf32>
    %104 = vector.multi_reduction <add>, %103, %cst_48 [1] : vector<16x32xf32> to vector<16xf32>
    %105 = vector.shape_cast %104 : vector<16xf32> to vector<16x1xf32>
    %cst_49 = arith.constant 3.200000e+01 : f32
    %106 = vector.broadcast %cst_49 : f32 to vector<16x1xf32>
    %107 = arith.divf %105, %106 : vector<16x1xf32>
    %108 = vector.broadcast %100 : vector<16x1xf32> to vector<16x32xf32>
    %109 = arith.subf %92, %108 : vector<16x32xf32>
    %cst_50 = arith.constant 9.99999996E-13 : f32
    %110 = vector.broadcast %cst_50 : f32 to vector<16x1xf32>
    %111 = arith.addf %107, %110 : vector<16x1xf32>
    %112 = math.rsqrt %111 : vector<16x1xf32>
    %113 = vector.broadcast %112 : vector<16x1xf32> to vector<16x32xf32>
    %114 = arith.mulf %109, %113 : vector<16x32xf32>
    %115 = vector.broadcast %94 : vector<1x32xf32> to vector<16x32xf32>
    %116 = arith.mulf %114, %115 : vector<16x32xf32>
    %117 = vector.broadcast %96 : vector<1x32xf32> to vector<16x32xf32>
    %118 = arith.addf %116, %117 : vector<16x32xf32>
    %c0_51 = arith.constant 0 : index
    %c0_52 = arith.constant 0 : index
    %c0_53 = arith.constant 0 : index
    %119 = vector.load %arg11[%c0_51, %c0_52, %c0_53] : memref<2x32x64xf32, #tpu.memory_space<vmem>>, vector<1x32x64xf32>
    %120 = vector.shape_cast %119 : vector<1x32x64xf32> to vector<32x64xf32>
    %cst_54 = arith.constant dense<0.000000e+00> : vector<16x64xf32>
    %121 = tpu.matmul %118, %120, %cst_54 {dimension_numbers = #tpu.dot_dimension_numbers<[1], [0], [0], [1], [0, 0, 1, 1], [], []>} : vector<16x32xf32>, vector<32x64xf32>, vector<16x64xf32> -> vector<16x64xf32>
    %c0_55 = arith.constant 0 : index
    %c0_56 = arith.constant 0 : index
    %c0_57 = arith.constant 0 : index
    %122 = vector.load %arg12[%c0_55, %c0_56, %c0_57] : memref<2x1x64xf32, #tpu.memory_space<vmem>>, vector<1x1x64xf32>
    %123 = vector.shape_cast %122 : vector<1x1x64xf32> to vector<1x64xf32>
    %124 = vector.broadcast %123 : vector<1x64xf32> to vector<16x64xf32>
    %125 = arith.addf %121, %124 : vector<16x64xf32>
    %126 = arith.mulf %125, %125 : vector<16x64xf32>
    %127 = arith.mulf %125, %126 : vector<16x64xf32>
    %cst_58 = arith.constant 4.471500e-02 : f32
    %128 = vector.broadcast %cst_58 : f32 to vector<16x64xf32>
    %129 = arith.mulf %128, %127 : vector<16x64xf32>
    %130 = arith.addf %125, %129 : vector<16x64xf32>
    %cst_59 = arith.constant 0.797884583 : f32
    %131 = vector.broadcast %cst_59 : f32 to vector<16x64xf32>
    %132 = arith.mulf %131, %130 : vector<16x64xf32>
    %133 = math.tanh %132 : vector<16x64xf32>
    %cst_60 = arith.constant 1.000000e+00 : f32
    %134 = vector.broadcast %cst_60 : f32 to vector<16x64xf32>
    %135 = arith.addf %134, %133 : vector<16x64xf32>
    %cst_61 = arith.constant 5.000000e-01 : f32
    %136 = vector.broadcast %cst_61 : f32 to vector<16x64xf32>
    %137 = arith.mulf %136, %135 : vector<16x64xf32>
    %138 = arith.mulf %125, %137 : vector<16x64xf32>
    %c0_62 = arith.constant 0 : index
    %c0_63 = arith.constant 0 : index
    %c0_64 = arith.constant 0 : index
    %139 = vector.load %arg13[%c0_62, %c0_63, %c0_64] : memref<2x64x32xf32, #tpu.memory_space<vmem>>, vector<1x64x32xf32>
    %140 = vector.shape_cast %139 : vector<1x64x32xf32> to vector<64x32xf32>
    %cst_65 = arith.constant dense<0.000000e+00> : vector<16x32xf32>
    %141 = tpu.matmul %138, %140, %cst_65 {dimension_numbers = #tpu.dot_dimension_numbers<[1], [0], [0], [1], [0, 0, 1, 1], [], []>} : vector<16x64xf32>, vector<64x32xf32>, vector<16x32xf32> -> vector<16x32xf32>
    %c0_66 = arith.constant 0 : index
    %c0_67 = arith.constant 0 : index
    %c0_68 = arith.constant 0 : index
    %142 = vector.load %arg14[%c0_66, %c0_67, %c0_68] : memref<2x1x32xf32, #tpu.memory_space<vmem>>, vector<1x1x32xf32>
    %143 = vector.shape_cast %142 : vector<1x1x32xf32> to vector<1x32xf32>
    %144 = vector.broadcast %143 : vector<1x32xf32> to vector<16x32xf32>
    %145 = arith.addf %141, %144 : vector<16x32xf32>
    %146 = arith.addf %145, %118 : vector<16x32xf32>
    %c0_69 = arith.constant 0 : index
    %c0_70 = arith.constant 0 : index
    %c0_71 = arith.constant 0 : index
    %147 = vector.load %arg15[%c0_69, %c0_70, %c0_71] : memref<2x1x32xf32, #tpu.memory_space<vmem>>, vector<1x1x32xf32>
    %148 = vector.shape_cast %147 : vector<1x1x32xf32> to vector<1x32xf32>
    %c0_72 = arith.constant 0 : index
    %c0_73 = arith.constant 0 : index
    %c0_74 = arith.constant 0 : index
    %149 = vector.load %arg16[%c0_72, %c0_73, %c0_74] : memref<2x1x32xf32, #tpu.memory_space<vmem>>, vector<1x1x32xf32>
    %150 = vector.shape_cast %149 : vector<1x1x32xf32> to vector<1x32xf32>
    %cst_75 = arith.constant dense<0.000000e+00> : vector<16xf32>
    %151 = vector.multi_reduction <add>, %146, %cst_75 [1] : vector<16x32xf32> to vector<16xf32>
    %152 = vector.shape_cast %151 : vector<16xf32> to vector<16x1xf32>
    %cst_76 = arith.constant 3.200000e+01 : f32
    %153 = vector.broadcast %cst_76 : f32 to vector<16x1xf32>
    %154 = arith.divf %152, %153 : vector<16x1xf32>
    %155 = vector.broadcast %154 : vector<16x1xf32> to vector<16x32xf32>
    %156 = arith.subf %146, %155 : vector<16x32xf32>
    %157 = arith.mulf %156, %156 : vector<16x32xf32>
    %cst_77 = arith.constant dense<0.000000e+00> : vector<16xf32>
    %158 = vector.multi_reduction <add>, %157, %cst_77 [1] : vector<16x32xf32> to vector<16xf32>
    %159 = vector.shape_cast %158 : vector<16xf32> to vector<16x1xf32>
    %cst_78 = arith.constant 3.200000e+01 : f32
    %160 = vector.broadcast %cst_78 : f32 to vector<16x1xf32>
    %161 = arith.divf %159, %160 : vector<16x1xf32>
    %162 = vector.broadcast %154 : vector<16x1xf32> to vector<16x32xf32>
    %163 = arith.subf %146, %162 : vector<16x32xf32>
    %cst_79 = arith.constant 9.99999996E-13 : f32
    %164 = vector.broadcast %cst_79 : f32 to vector<16x1xf32>
    %165 = arith.addf %161, %164 : vector<16x1xf32>
    %166 = math.rsqrt %165 : vector<16x1xf32>
    %167 = vector.broadcast %166 : vector<16x1xf32> to vector<16x32xf32>
    %168 = arith.mulf %163, %167 : vector<16x32xf32>
    %169 = vector.broadcast %148 : vector<1x32xf32> to vector<16x32xf32>
    %170 = arith.mulf %168, %169 : vector<16x32xf32>
    %171 = vector.broadcast %150 : vector<1x32xf32> to vector<16x32xf32>
    %172 = arith.addf %170, %171 : vector<16x32xf32>
    %c1 = arith.constant 1 : index
    %c0_80 = arith.constant 0 : index
    %c0_81 = arith.constant 0 : index
    %173 = vector.load %arg5[%c1, %c0_80, %c0_81] : memref<2x32x96xf32, #tpu.memory_space<vmem>>, vector<1x32x96xf32>
    %174 = vector.shape_cast %173 : vector<1x32x96xf32> to vector<32x96xf32>
    %cst_82 = arith.constant dense<0.000000e+00> : vector<16x96xf32>
    %175 = tpu.matmul %172, %174, %cst_82 {dimension_numbers = #tpu.dot_dimension_numbers<[1], [0], [0], [1], [0, 0, 1, 1], [], []>} : vector<16x32xf32>, vector<32x96xf32>, vector<16x96xf32> -> vector<16x96xf32>
    %c1_83 = arith.constant 1 : index
    %c0_84 = arith.constant 0 : index
    %c0_85 = arith.constant 0 : index
    %176 = vector.load %arg6[%c1_83, %c0_84, %c0_85] : memref<2x1x96xf32, #tpu.memory_space<vmem>>, vector<1x1x96xf32>
    %177 = vector.shape_cast %176 : vector<1x1x96xf32> to vector<1x96xf32>
    %178 = vector.broadcast %177 : vector<1x96xf32> to vector<16x96xf32>
    %179 = arith.addf %175, %178 : vector<16x96xf32>
    %180 = vector.shape_cast %179 : vector<16x96xf32> to vector<2x8x96xf32>
    %181 = vector.extract_strided_slice %180 {offsets = [0, 0, 0], sizes = [2, 8, 16], strides = [1, 1, 1]} : vector<2x8x96xf32> to vector<2x8x16xf32>
    %182 = vector.extract_strided_slice %180 {offsets = [0, 0, 32], sizes = [2, 8, 16], strides = [1, 1, 1]} : vector<2x8x96xf32> to vector<2x8x16xf32>
    %183 = vector.extract_strided_slice %180 {offsets = [0, 0, 64], sizes = [2, 8, 16], strides = [1, 1, 1]} : vector<2x8x96xf32> to vector<2x8x16xf32>
    "tpu.trace_start"() <{level = 10 : i32, message = "bqd,bkd->bqk"}> : () -> ()
    %cst_86 = arith.constant dense<0.000000e+00> : vector<2x8x8xf32>
    %184 = tpu.matmul %181, %182, %cst_86 {dimension_numbers = #tpu.dot_dimension_numbers<[2], [2], [1], [1], [0, 0, 0, 1, 1, 1], [0], [0]>} : vector<2x8x16xf32>, vector<2x8x16xf32>, vector<2x8x8xf32> -> vector<2x8x8xf32>
    "tpu.trace_stop"() : () -> ()
    %cst_87 = arith.constant 2.500000e-01 : f32
    %185 = vector.broadcast %cst_87 : f32 to vector<2x8x8xf32>
    %186 = arith.mulf %184, %185 : vector<2x8x8xf32>
    %187 = vector.broadcast %36 : vector<2x1x8xf32> to vector<2x8x8xf32>
    %188 = arith.addf %186, %187 : vector<2x8x8xf32>
    %cst_88 = arith.constant dense<0xFF800000> : vector<2x8xf32>
    %189 = vector.multi_reduction <maximumf>, %188, %cst_88 [2] : vector<2x8x8xf32> to vector<2x8xf32>
    %190 = vector.shape_cast %189 : vector<2x8xf32> to vector<2x8x1xf32>
    %191 = vector.broadcast %190 : vector<2x8x1xf32> to vector<2x8x8xf32>
    %192 = arith.subf %188, %191 : vector<2x8x8xf32>
    %193 = math.exp %192 : vector<2x8x8xf32>
    %cst_89 = arith.constant dense<0.000000e+00> : vector<2x8xf32>
    %194 = vector.multi_reduction <add>, %193, %cst_89 [2] : vector<2x8x8xf32> to vector<2x8xf32>
    %195 = vector.shape_cast %194 : vector<2x8xf32> to vector<2x8x1xf32>
    %196 = tpu.reciprocal %195 {approx = true} : vector<2x8x1xf32> -> vector<2x8x1xf32>
    %197 = vector.broadcast %196 : vector<2x8x1xf32> to vector<2x8x8xf32>
    %198 = arith.mulf %193, %197 : vector<2x8x8xf32>
    "tpu.trace_start"() <{level = 10 : i32, message = "bqk,bkd->bqd"}> : () -> ()
    %cst_90 = arith.constant dense<0.000000e+00> : vector<2x8x16xf32>
    %199 = tpu.matmul %198, %183, %cst_90 {dimension_numbers = #tpu.dot_dimension_numbers<[2], [1], [1], [2], [0, 0, 0, 1, 1, 2], [0], [0]>} : vector<2x8x8xf32>, vector<2x8x16xf32>, vector<2x8x16xf32> -> vector<2x8x16xf32>
    "tpu.trace_stop"() : () -> ()
    %200 = vector.extract_strided_slice %180 {offsets = [0, 0, 16], sizes = [2, 8, 16], strides = [1, 1, 1]} : vector<2x8x96xf32> to vector<2x8x16xf32>
    %201 = vector.extract_strided_slice %180 {offsets = [0, 0, 48], sizes = [2, 8, 16], strides = [1, 1, 1]} : vector<2x8x96xf32> to vector<2x8x16xf32>
    %202 = vector.extract_strided_slice %180 {offsets = [0, 0, 80], sizes = [2, 8, 16], strides = [1, 1, 1]} : vector<2x8x96xf32> to vector<2x8x16xf32>
    "tpu.trace_start"() <{level = 10 : i32, message = "bqd,bkd->bqk"}> : () -> ()
    %cst_91 = arith.constant dense<0.000000e+00> : vector<2x8x8xf32>
    %203 = tpu.matmul %200, %201, %cst_91 {dimension_numbers = #tpu.dot_dimension_numbers<[2], [2], [1], [1], [0, 0, 0, 1, 1, 1], [0], [0]>} : vector<2x8x16xf32>, vector<2x8x16xf32>, vector<2x8x8xf32> -> vector<2x8x8xf32>
    "tpu.trace_stop"() : () -> ()
    %cst_92 = arith.constant 2.500000e-01 : f32
    %204 = vector.broadcast %cst_92 : f32 to vector<2x8x8xf32>
    %205 = arith.mulf %203, %204 : vector<2x8x8xf32>
    %206 = vector.broadcast %36 : vector<2x1x8xf32> to vector<2x8x8xf32>
    %207 = arith.addf %205, %206 : vector<2x8x8xf32>
    %cst_93 = arith.constant dense<0xFF800000> : vector<2x8xf32>
    %208 = vector.multi_reduction <maximumf>, %207, %cst_93 [2] : vector<2x8x8xf32> to vector<2x8xf32>
    %209 = vector.shape_cast %208 : vector<2x8xf32> to vector<2x8x1xf32>
    %210 = vector.broadcast %209 : vector<2x8x1xf32> to vector<2x8x8xf32>
    %211 = arith.subf %207, %210 : vector<2x8x8xf32>
    %212 = math.exp %211 : vector<2x8x8xf32>
    %cst_94 = arith.constant dense<0.000000e+00> : vector<2x8xf32>
    %213 = vector.multi_reduction <add>, %212, %cst_94 [2] : vector<2x8x8xf32> to vector<2x8xf32>
    %214 = vector.shape_cast %213 : vector<2x8xf32> to vector<2x8x1xf32>
    %215 = tpu.reciprocal %214 {approx = true} : vector<2x8x1xf32> -> vector<2x8x1xf32>
    %216 = vector.broadcast %215 : vector<2x8x1xf32> to vector<2x8x8xf32>
    %217 = arith.mulf %212, %216 : vector<2x8x8xf32>
    "tpu.trace_start"() <{level = 10 : i32, message = "bqk,bkd->bqd"}> : () -> ()
    %cst_95 = arith.constant dense<0.000000e+00> : vector<2x8x16xf32>
    %218 = tpu.matmul %217, %202, %cst_95 {dimension_numbers = #tpu.dot_dimension_numbers<[2], [1], [1], [2], [0, 0, 0, 1, 1, 2], [0], [0]>} : vector<2x8x8xf32>, vector<2x8x16xf32>, vector<2x8x16xf32> -> vector<2x8x16xf32>
    "tpu.trace_stop"() : () -> ()
    %219 = tpu.concatenate %199, %218 in 2 : vector<2x8x16xf32>, vector<2x8x16xf32> -> vector<2x8x32xf32>
    %220 = vector.shape_cast %219 : vector<2x8x32xf32> to vector<16x32xf32>
    %c1_96 = arith.constant 1 : index
    %c0_97 = arith.constant 0 : index
    %c0_98 = arith.constant 0 : index
    %221 = vector.load %arg7[%c1_96, %c0_97, %c0_98] : memref<2x32x32xf32, #tpu.memory_space<vmem>>, vector<1x32x32xf32>
    %222 = vector.shape_cast %221 : vector<1x32x32xf32> to vector<32x32xf32>
    %cst_99 = arith.constant dense<0.000000e+00> : vector<16x32xf32>
    %223 = tpu.matmul %220, %222, %cst_99 {dimension_numbers = #tpu.dot_dimension_numbers<[1], [0], [0], [1], [0, 0, 1, 1], [], []>} : vector<16x32xf32>, vector<32x32xf32>, vector<16x32xf32> -> vector<16x32xf32>
    %c1_100 = arith.constant 1 : index
    %c0_101 = arith.constant 0 : index
    %c0_102 = arith.constant 0 : index
    %224 = vector.load %arg8[%c1_100, %c0_101, %c0_102] : memref<2x1x32xf32, #tpu.memory_space<vmem>>, vector<1x1x32xf32>
    %225 = vector.shape_cast %224 : vector<1x1x32xf32> to vector<1x32xf32>
    %226 = vector.broadcast %225 : vector<1x32xf32> to vector<16x32xf32>
    %227 = arith.addf %223, %226 : vector<16x32xf32>
    %228 = arith.addf %227, %172 : vector<16x32xf32>
    %c1_103 = arith.constant 1 : index
    %c0_104 = arith.constant 0 : index
    %c0_105 = arith.constant 0 : index
    %229 = vector.load %arg9[%c1_103, %c0_104, %c0_105] : memref<2x1x32xf32, #tpu.memory_space<vmem>>, vector<1x1x32xf32>
    %230 = vector.shape_cast %229 : vector<1x1x32xf32> to vector<1x32xf32>
    %c1_106 = arith.constant 1 : index
    %c0_107 = arith.constant 0 : index
    %c0_108 = arith.constant 0 : index
    %231 = vector.load %arg10[%c1_106, %c0_107, %c0_108] : memref<2x1x32xf32, #tpu.memory_space<vmem>>, vector<1x1x32xf32>
    %232 = vector.shape_cast %231 : vector<1x1x32xf32> to vector<1x32xf32>
    %cst_109 = arith.constant dense<0.000000e+00> : vector<16xf32>
    %233 = vector.multi_reduction <add>, %228, %cst_109 [1] : vector<16x32xf32> to vector<16xf32>
    %234 = vector.shape_cast %233 : vector<16xf32> to vector<16x1xf32>
    %cst_110 = arith.constant 3.200000e+01 : f32
    %235 = vector.broadcast %cst_110 : f32 to vector<16x1xf32>
    %236 = arith.divf %234, %235 : vector<16x1xf32>
    %237 = vector.broadcast %236 : vector<16x1xf32> to vector<16x32xf32>
    %238 = arith.subf %228, %237 : vector<16x32xf32>
    %239 = arith.mulf %238, %238 : vector<16x32xf32>
    %cst_111 = arith.constant dense<0.000000e+00> : vector<16xf32>
    %240 = vector.multi_reduction <add>, %239, %cst_111 [1] : vector<16x32xf32> to vector<16xf32>
    %241 = vector.shape_cast %240 : vector<16xf32> to vector<16x1xf32>
    %cst_112 = arith.constant 3.200000e+01 : f32
    %242 = vector.broadcast %cst_112 : f32 to vector<16x1xf32>
    %243 = arith.divf %241, %242 : vector<16x1xf32>
    %244 = vector.broadcast %236 : vector<16x1xf32> to vector<16x32xf32>
    %245 = arith.subf %228, %244 : vector<16x32xf32>
    %cst_113 = arith.constant 9.99999996E-13 : f32
    %246 = vector.broadcast %cst_113 : f32 to vector<16x1xf32>
    %247 = arith.addf %243, %246 : vector<16x1xf32>
    %248 = math.rsqrt %247 : vector<16x1xf32>
    %249 = vector.broadcast %248 : vector<16x1xf32> to vector<16x32xf32>
    %250 = arith.mulf %245, %249 : vector<16x32xf32>
    %251 = vector.broadcast %230 : vector<1x32xf32> to vector<16x32xf32>
    %252 = arith.mulf %250, %251 : vector<16x32xf32>
    %253 = vector.broadcast %232 : vector<1x32xf32> to vector<16x32xf32>
    %254 = arith.addf %252, %253 : vector<16x32xf32>
    %c1_114 = arith.constant 1 : index
    %c0_115 = arith.constant 0 : index
    %c0_116 = arith.constant 0 : index
    %255 = vector.load %arg11[%c1_114, %c0_115, %c0_116] : memref<2x32x64xf32, #tpu.memory_space<vmem>>, vector<1x32x64xf32>
    %256 = vector.shape_cast %255 : vector<1x32x64xf32> to vector<32x64xf32>
    %cst_117 = arith.constant dense<0.000000e+00> : vector<16x64xf32>
    %257 = tpu.matmul %254, %256, %cst_117 {dimension_numbers = #tpu.dot_dimension_numbers<[1], [0], [0], [1], [0, 0, 1, 1], [], []>} : vector<16x32xf32>, vector<32x64xf32>, vector<16x64xf32> -> vector<16x64xf32>
    %c1_118 = arith.constant 1 : index
    %c0_119 = arith.constant 0 : index
    %c0_120 = arith.constant 0 : index
    %258 = vector.load %arg12[%c1_118, %c0_119, %c0_120] : memref<2x1x64xf32, #tpu.memory_space<vmem>>, vector<1x1x64xf32>
    %259 = vector.shape_cast %258 : vector<1x1x64xf32> to vector<1x64xf32>
    %260 = vector.broadcast %259 : vector<1x64xf32> to vector<16x64xf32>
    %261 = arith.addf %257, %260 : vector<16x64xf32>
    %262 = arith.mulf %261, %261 : vector<16x64xf32>
    %263 = arith.mulf %261, %262 : vector<16x64xf32>
    %cst_121 = arith.constant 4.471500e-02 : f32
    %264 = vector.broadcast %cst_121 : f32 to vector<16x64xf32>
    %265 = arith.mulf %264, %263 : vector<16x64xf32>
    %266 = arith.addf %261, %265 : vector<16x64xf32>
    %cst_122 = arith.constant 0.797884583 : f32
    %267 = vector.broadcast %cst_122 : f32 to vector<16x64xf32>
    %268 = arith.mulf %267, %266 : vector<16x64xf32>
    %269 = math.tanh %268 : vector<16x64xf32>
    %cst_123 = arith.constant 1.000000e+00 : f32
    %270 = vector.broadcast %cst_123 : f32 to vector<16x64xf32>
    %271 = arith.addf %270, %269 : vector<16x64xf32>
    %cst_124 = arith.constant 5.000000e-01 : f32
    %272 = vector.broadcast %cst_124 : f32 to vector<16x64xf32>
    %273 = arith.mulf %272, %271 : vector<16x64xf32>
    %274 = arith.mulf %261, %273 : vector<16x64xf32>
    %c1_125 = arith.constant 1 : index
    %c0_126 = arith.constant 0 : index
    %c0_127 = arith.constant 0 : index
    %275 = vector.load %arg13[%c1_125, %c0_126, %c0_127] : memref<2x64x32xf32, #tpu.memory_space<vmem>>, vector<1x64x32xf32>
    %276 = vector.shape_cast %275 : vector<1x64x32xf32> to vector<64x32xf32>
    %cst_128 = arith.constant dense<0.000000e+00> : vector<16x32xf32>
    %277 = tpu.matmul %274, %276, %cst_128 {dimension_numbers = #tpu.dot_dimension_numbers<[1], [0], [0], [1], [0, 0, 1, 1], [], []>} : vector<16x64xf32>, vector<64x32xf32>, vector<16x32xf32> -> vector<16x32xf32>
    %c1_129 = arith.constant 1 : index
    %c0_130 = arith.constant 0 : index
    %c0_131 = arith.constant 0 : index
    %278 = vector.load %arg14[%c1_129, %c0_130, %c0_131] : memref<2x1x32xf32, #tpu.memory_space<vmem>>, vector<1x1x32xf32>
    %279 = vector.shape_cast %278 : vector<1x1x32xf32> to vector<1x32xf32>
    %280 = vector.broadcast %279 : vector<1x32xf32> to vector<16x32xf32>
    %281 = arith.addf %277, %280 : vector<16x32xf32>
    %282 = arith.addf %281, %254 : vector<16x32xf32>
    %c1_132 = arith.constant 1 : index
    %c0_133 = arith.constant 0 : index
    %c0_134 = arith.constant 0 : index
    %283 = vector.load %arg15[%c1_132, %c0_133, %c0_134] : memref<2x1x32xf32, #tpu.memory_space<vmem>>, vector<1x1x32xf32>
    %284 = vector.shape_cast %283 : vector<1x1x32xf32> to vector<1x32xf32>
    %c1_135 = arith.constant 1 : index
    %c0_136 = arith.constant 0 : index
    %c0_137 = arith.constant 0 : index
    %285 = vector.load %arg16[%c1_135, %c0_136, %c0_137] : memref<2x1x32xf32, #tpu.memory_space<vmem>>, vector<1x1x32xf32>
    %286 = vector.shape_cast %285 : vector<1x1x32xf32> to vector<1x32xf32>
    %cst_138 = arith.constant dense<0.000000e+00> : vector<16xf32>
    %287 = vector.multi_reduction <add>, %282, %cst_138 [1] : vector<16x32xf32> to vector<16xf32>
    %288 = vector.shape_cast %287 : vector<16xf32> to vector<16x1xf32>
    %cst_139 = arith.constant 3.200000e+01 : f32
    %289 = vector.broadcast %cst_139 : f32 to vector<16x1xf32>
    %290 = arith.divf %288, %289 : vector<16x1xf32>
    %291 = vector.broadcast %290 : vector<16x1xf32> to vector<16x32xf32>
    %292 = arith.subf %282, %291 : vector<16x32xf32>
    %293 = arith.mulf %292, %292 : vector<16x32xf32>
    %cst_140 = arith.constant dense<0.000000e+00> : vector<16xf32>
    %294 = vector.multi_reduction <add>, %293, %cst_140 [1] : vector<16x32xf32> to vector<16xf32>
    %295 = vector.shape_cast %294 : vector<16xf32> to vector<16x1xf32>
    %cst_141 = arith.constant 3.200000e+01 : f32
    %296 = vector.broadcast %cst_141 : f32 to vector<16x1xf32>
    %297 = arith.divf %295, %296 : vector<16x1xf32>
    %298 = vector.broadcast %290 : vector<16x1xf32> to vector<16x32xf32>
    %299 = arith.subf %282, %298 : vector<16x32xf32>
    %cst_142 = arith.constant 9.99999996E-13 : f32
    %300 = vector.broadcast %cst_142 : f32 to vector<16x1xf32>
    %301 = arith.addf %297, %300 : vector<16x1xf32>
    %302 = math.rsqrt %301 : vector<16x1xf32>
    %303 = vector.broadcast %302 : vector<16x1xf32> to vector<16x32xf32>
    %304 = arith.mulf %299, %303 : vector<16x32xf32>
    %305 = vector.broadcast %284 : vector<1x32xf32> to vector<16x32xf32>
    %306 = arith.mulf %304, %305 : vector<16x32xf32>
    %307 = vector.broadcast %286 : vector<1x32xf32> to vector<16x32xf32>
    %308 = arith.addf %306, %307 : vector<16x32xf32>
    %309 = vector.extract_strided_slice %308 {offsets = [0, 0], sizes = [1, 32], strides = [1, 1]} : vector<16x32xf32> to vector<1x32xf32>
    %310 = vector.extract_strided_slice %308 {offsets = [8, 0], sizes = [1, 32], strides = [1, 1]} : vector<16x32xf32> to vector<1x32xf32>
    %311 = tpu.concatenate %309, %310 in 0 : vector<1x32xf32>, vector<1x32xf32> -> vector<2x32xf32>
    %c0_143 = arith.constant 0 : index
    %c0_144 = arith.constant 0 : index
    %312 = vector.load %arg17[%c0_143, %c0_144] : memref<32x32xf32, #tpu.memory_space<vmem>>, vector<32x32xf32>
    %cst_145 = arith.constant dense<0.000000e+00> : vector<2x32xf32>
    %313 = tpu.matmul %311, %312, %cst_145 {dimension_numbers = #tpu.dot_dimension_numbers<[1], [0], [0], [1], [0, 0, 1, 1], [], []>} : vector<2x32xf32>, vector<32x32xf32>, vector<2x32xf32> -> vector<2x32xf32>
    %c0_146 = arith.constant 0 : index
    %c0_147 = arith.constant 0 : index
    %314 = vector.load %arg18[%c0_146, %c0_147] : memref<1x32xf32, #tpu.memory_space<vmem>>, vector<1x32xf32>
    %315 = vector.broadcast %314 : vector<1x32xf32> to vector<2x32xf32>
    %316 = arith.addf %313, %315 : vector<2x32xf32>
    %317 = math.tanh %316 : vector<2x32xf32>
    %c0_148 = arith.constant 0 : index
    %c0_149 = arith.constant 0 : index
    %318 = vector.load %arg19[%c0_148, %c0_149] : memref<32x3xf32, #tpu.memory_space<vmem>>, vector<32x3xf32>
    %cst_150 = arith.constant dense<0.000000e+00> : vector<2x3xf32>
    %319 = tpu.matmul %317, %318, %cst_150 {dimension_numbers = #tpu.dot_dimension_numbers<[1], [0], [0], [1], [0, 0, 1, 1], [], []>} : vector<2x32xf32>, vector<32x3xf32>, vector<2x3xf32> -> vector<2x3xf32>
    %c0_151 = arith.constant 0 : index
    %c0_152 = arith.constant 0 : index
    %320 = vector.load %arg20[%c0_151, %c0_152] : memref<1x3xf32, #tpu.memory_space<vmem>>, vector<1x3xf32>
    %321 = vector.broadcast %320 : vector<1x3xf32> to vector<2x3xf32>
    %322 = arith.addf %319, %321 : vector<2x3xf32>
    %c0_153 = arith.constant 0 : index
    %c0_154 = arith.constant 0 : index
    %323 = vector.load %arg21[%c0_153, %c0_154] : memref<2x3xf32, #tpu.memory_space<vmem>>, vector<2x3xf32>
    tpu.vector_store %arg21[%c0_153, %c0_154], %322 {strides = array<i32>} : memref<2x3xf32, #tpu.memory_space<vmem>>, vector<2x3xf32>,
    return
  }
}

</mosaic_0001>

<bundles_post_ra>
// kernel: bert_multiclassifier_forward.1
= control target key start
LH: loop header
LB: loop body
LE: loop exit
PB: predicated region body
PF: predicated region fallthrough
CT: control target
= control target key end

     0   :  { %s2096_s0 = inlined_call_operand.vmem [shape: f32[2,8,32], index: 0, kind: input, shape index: {}]   ;;  %s2097_s1 = inlined_call_operand.vmem [shape: f32[8,32], index: 1, kind: input, shape index: {}]   ;;  %s2098_s2 = inlined_call_operand.vmem [shape: s32[2,8], index: 2, kind: input, shape index: {}]   ;;  %s2099_s3 = inlined_call_operand.vmem [shape: f32[1,32], index: 3, kind: input, shape index: {}]   ;;  %s2100_s4 = inlined_call_operand.vmem [shape: f32[1,32], index: 4, kind: input, shape index: {}]   ;;  %s2101_s5 = inlined_call_operand.vmem [shape: f32[2,32,96], index: 5, kind: input, shape index: {}]   ;;  %s2102_s6 = inlined_call_operand.vmem [shape: f32[2,1,96], index: 6, kind: input, shape index: {}]   ;;  %s2103_s7 = inlined_call_operand.vmem [shape: f32[2,32,32], index: 7, kind: input, shape index: {}]   ;;  %s2104_s8 = inlined_call_operand.vmem [shape: f32[2,1,32], index: 8, kind: input, shape index: {}]   ;;  %s2105_s9 = inlined_call_operand.vmem [shape: f32[2,1,32], index: 9, kind: input, shape index: {}]   ;;  %s2106_s10 = inlined_call_operand.vmem [shape: f32[2,1,32], index: 10, kind: input, shape index: {}]   ;;  %s2107_s11 = inlined_call_operand.vmem [shape: f32[2,32,64], index: 11, kind: input, shape index: {}]   ;;  %s2108_s12 = inlined_call_operand.vmem [shape: f32[2,1,64], index: 12, kind: input, shape index: {}]   ;;  %s2109_s13 = inlined_call_operand.vmem [shape: f32[2,64,32], index: 13, kind: input, shape index: {}]   ;;  %s2110_s14 = inlined_call_operand.vmem [shape: f32[2,1,32], index: 14, kind: input, shape index: {}]   ;;  %s2111_s15 = inlined_call_operand.vmem [shape: f32[2,1,32], index: 15, kind: input, shape index: {}]   ;;  %s2112_s16 = inlined_call_operand.vmem [shape: f32[2,1,32], index: 16, kind: input, shape index: {}]   ;;  %s2113_s17 = inlined_call_operand.vmem [shape: f32[32,32], index: 17, kind: input, shape index: {}]   ;;  %s2114_s18 = inlined_call_operand.vmem [shape: f32[1,32], index: 18, kind: input, shape index: {}]   ;;  %s2115_s19 = inlined_call_operand.vmem [shape: f32[32,3], index: 19, kind: input, shape index: {}]   ;;  %s2116_s20 = inlined_call_operand.vmem [shape: f32[1,3], index: 20, kind: input, shape index: {}]   ;;  %s2117_s21 = inlined_call_operand.hbm [shape: f32[2,3], index: 21, kind: output, shape index: {}]  }
   0x1   :  { %2123 = sst [smem:[#allocation5_spill]] %s2096_s0 }
   0x2   :  { %2124 = sst [smem:[#allocation6_spill]] %s2097_s1 }
   0x3   :  { %2125 = sst [smem:[#allocation7_spill]] %s2098_s2 }
   0x4   :  { %2126 = sst [smem:[#allocation8_spill]] %s2099_s3 }
   0x5   :  { %2127 = sst [smem:[#allocation9_spill]] %s2100_s4 }
   0x6   :  { %2128 = sst [smem:[#allocation10_spill]] %s2101_s5 }
   0x7   :  { %2129 = sst [smem:[#allocation11_spill]] %s2112_s16 }
   0x8   :  { %s2130_s26 = sld [smem:[#allocation5_spill]]  ;;  %vm76_vm0 = vcmask 261120  }
   0x9   :  { %s2131_s16 = sld [smem:[#allocation6_spill]] }
   0xe   :  { %v69_v0 = vld [vmem:[%s2130_s26] sm:$0xff]  ;;  %v70_v2 = vld [vmem:[%s2130_s26 + $0x8] sm:$0xff] }
   0xf   :  { %v71_v1 = vld [vmem:[%s2131_s16] sm:$0xff] }
  0x10   :  { %v72_v3 = vadd.f32 %v71_v1, %v69_v0  ;;  %v73_v5 = vadd.f32 %v71_v1, %v70_v2 }
  0x12   :  { %v77_v4 = vsel %vm76_vm0, %v72_v3, 0.0 }
  0x13   :  { %78 = vadd.xlane.f32.xlu0 %v77_v4 }
  0x14   :  { %26 = vsyncpa [#allocation3], 0  ;;  %v80_v6 = vsel %vm76_vm0, %v73_v5, 0.0  ;;  %v1576_v7 = vmov 32.0   ;;  %s2132_s4 = sld [smem:[#allocation10_spill]]  ;;  %s1577_s0 = smov 80  }
  0x15   :  { %1486 = vrcp.f32 %v1576_v7  ;;  %s2133_s26 = sld [smem:[#allocation8_spill]]  ;;  %v1468_v56 = vld [vmem:[%s2102_s6] ss:$0 sm:$0xff]  ;;  %s1578_s30 = smov 96   ;;  %vm184_vm8 = vcmask 130048   ;;  %vm244_vm9 = vcmask 64512  }
  0x16   :  { %s2134_s28 = sld [smem:[#allocation9_spill]]  ;;  %s1579_s5 = smov 112  }
  0x17   :  { %s2135_s1 = sld [smem:[#allocation7_spill]]  ;;  %s1580_s24 = smov 64  }
  0x18   :  { %s1581_s2 = smov 48   ;;  %s2121_s25 = smov 16  }
  0x19   :  { %s2136_s16 = sld [smem:[#allocation11_spill]] }
  0x1a   :  { %v147_v24 = vld [vmem:[%s2132_s4 + $0x18] sm:$0xff]  ;;  %v146_v25 = vld [vmem:[%s2132_s4 + $0x10] sm:$0xff]  ;;  %v145_v26 = vld [vmem:[%s2132_s4 + $0x8] sm:$0xff] }
  0x1b   :  { %81 = vadd.xlane.f32.xlu0 %v80_v6  ;;  %v1487_v8 = vpop.eup %1486  ;;  %170 = vmatpush.msra.mxu0 %v147_v24  ;;  %v144_v27 = vld [vmem:[%s2132_s4] sm:$0xff] }
  0x1c   :  { %v84_v9 = vmul.f32 32.0, %v1487_v8  ;;  %vm88_vm1 = vweird.f32 %v1487_v8  ;;  %v1466_v42 = vld [vmem:[%s2133_s26] ss:$0 sm:$0xff] }
  0x1d   :  { %171 = vmatpush.msra.mxu0 %v146_v25  ;;  %v1467_v46 = vld [vmem:[%s2134_s28] ss:$0 sm:$0xff] }
  0x1e   :  { %v85_v10 = vsub.f32 1.0, %v84_v9 }
  0x1f   :  { %172 = vmatpush.msra.mxu0 %v145_v26 }
  0x20   :  { %v86_v11 = vmul.f32 %v1487_v8, %v85_v10 }
  0x21   :  { %173 = vmatpush.msra.mxu0 %v144_v27 }
  0x22   :  { %v87_v12 = vadd.f32 %v1487_v8, %v86_v11 }
  0x24   :  { %v1705_v13 = vsel %vm88_vm1, %v1487_v8, %v87_v12  ;;  %vm625_vm1 = vcmask 523264  }
  0x86   :  { %v79_v14 = vpop.xlane.xlu0 %78 }
  0x87   :  { %v90_v15 = vmul.f32 %v1705_v13, %v79_v14 }
  0x89   :  { %v92_v16 = vsub.f32 %v72_v3, %v90_v15  ;;  %v138_v3 = vld [vmem:[%s2135_s1] sm:$0x3]  ;;  %s2137_s1 = smov 16  }
  0x8a   :  { %v139_v4 = vcvt.s32.f32 %v138_v3 }
  0x8b   :  { %v94_v17 = vmul.f32 %v92_v16, %v92_v16 }
  0x8d   :  { %v96_v18 = vsel %vm76_vm0, %v94_v17, 0.0 }
  0x8e   :  { %97 = vadd.xlane.f32.xlu1 %v96_v18  ;;  %v82_v19 = vpop.xlane.xlu0 %81 }
  0x8f   :  { %v91_v20 = vmul.f32 %v1705_v13, %v82_v19 }
  0x91   :  { %v93_v21 = vsub.f32 %v73_v5, %v91_v20  ;;  %v140_v5 = vsub.f32 1.0, %v139_v4 }
  0x93   :  { %v95_v22 = vmul.f32 %v93_v21, %v93_v21  ;;  %v141_v6 = vmul.f32 -10000.0, %v140_v5 }
  0x95   :  { %v99_v23 = vsel %vm76_vm0, %v95_v22, 0.0  ;;  %v1771_v7 = vperm.slane %v141_v6, 0  ;;  %v143_v12 = vrot.slane %v141_v6, 1 }
  0x96   :  { %100 = vadd.xlane.f32.xlu1 %v99_v23 }
  0x97   :  { %v1775_v14 = vperm.slane %v143_v12, 0 }
 0x101   :  { %v98_v28 = vpop.xlane.xlu1 %97 }
 0x102   :  { %v102_v29 = vmul.f32 %v98_v28, %v1705_v13 }
 0x104   :  { %v104_v30 = vadd.f32 1e-12, %v102_v29 }
 0x106   :  { %1488 = vrsqrt.f32 %v104_v30  ;;  %vm112_vm3 = vweird.f32 %v104_v30 }
 0x109   :  { %v101_v31 = vpop.xlane.xlu1 %100 }
 0x10a   :  { %v103_v32 = vmul.f32 %v101_v31, %v1705_v13 }
 0x10c   :  { %v1489_v33 = vpop.eup %1488  ;;  %v105_v34 = vadd.f32 1e-12, %v103_v32 }
 0x10d   :  { %v107_v35 = vmul.f32 %v1489_v33, %v104_v30  ;;  %vm113_vm2 = vweird.f32 %v1489_v33 }
 0x10e   :  { %1490 = vrsqrt.f32 %v105_v34  ;;  %vm114_vm4 = vmor %vm112_vm3, %vm113_vm2  ;;  %vm122_vm6 = vweird.f32 %v105_v34 }
 0x10f   :  { %v108_v36 = vmul.f32 %v1489_v33, %v107_v35 }
 0x111   :  { %v109_v37 = vmul.f32 0.5, %v108_v36 }
 0x113   :  { %v110_v38 = vsub.f32 1.5, %v109_v37 }
 0x114   :  { %v1491_v39 = vpop.eup %1490 }
 0x115   :  { %v111_v40 = vmul.f32 %v1489_v33, %v110_v38  ;;  %v117_v41 = vmul.f32 %v1491_v39, %v105_v34  ;;  %vm123_vm5 = vweird.f32 %v1491_v39 }
 0x116   :  { %vm124_vm7 = vmor %vm122_vm6, %vm123_vm5 }
 0x117   :  { %v115_v43 = vsel %vm114_vm4, %v1489_v33, %v111_v40  ;;  %v118_v44 = vmul.f32 %v1491_v39, %v117_v41 }
 0x118   :  { %v126_v45 = vmul.f32 %v115_v43, %v92_v16 }
 0x119   :  { %v119_v47 = vmul.f32 0.5, %v118_v44 }
 0x11a   :  { %v131_v48 = vmul.f32 %v1466_v42, %v126_v45 }
 0x11b   :  { %v120_v49 = vsub.f32 1.5, %v119_v47 }
 0x11c   :  { %v1731_v50 = vadd.f32 %v1467_v46, %v131_v48 }
 0x11d   :  { %v121_v51 = vmul.f32 %v1491_v39, %v120_v49 }
 0x11e   :  { %1373 = vmatmul.msk.f32.vlgmr.msra.gmra.mxu0 %vm76_vm0, %v1731_v50 }
 0x11f   :  { %v125_v52 = vsel %vm124_vm7, %v1491_v39, %v121_v51 }
 0x120   :  { %v127_v53 = vmul.f32 %v125_v52, %v93_v21 }
 0x122   :  { %v132_v54 = vmul.f32 %v1466_v42, %v127_v53 }
 0x124   :  { %v1735_v55 = vadd.f32 %v1467_v46, %v132_v54 }
 0x126   :  { %1374 = vmatmul.msk.f32.gmra.mxu0 %vm76_vm0, %v1735_v55 }
 0x19b   :  { %v175_v57 = vpop.f32.mrf.mxu0 }
 0x19c   :  { %v1742_v58 = vadd.f32 %v1468_v56, %v175_v57 }
 0x19e   :  { %321 = vrot.lane.b32.xlu0 %v1742_v58, %s1577_s0  ;;  %182 = vrot.lane.b32.xlu2 %v1742_v58, %s1578_s30 }
 0x19f   :  { %319 = vrot.lane.b32.xlu1 %v1742_v58, %s1579_s5 }
 0x1a3   :  { %v178_v59 = vpop.f32.mrf.mxu0 }
 0x1a4   :  { %v1750_v60 = vadd.f32 %v1468_v56, %v178_v59 }
 0x1a6   :  { %210 = vrot.lane.b32.xlu2 %v1750_v60, %s1578_s30  ;;  %v1451_v27 = vpack.i.bf16 %v1750_v60, %v1742_v58 }
 0x1ae   :  { %349 = vrot.lane.b32.xlu2 %v1750_v60, %s1577_s0 }
 0x1b6   :  { %347 = vrot.lane.b32.xlu2 %v1750_v60, %s1579_s5 }
 0x1f8   :  { %v183_v61 = vpop.permute.xlu2 %182 }
 0x1f9   :  { %1375 = vmatpush.xpose.msk.msrb.mxu0 %vm184_vm8, %v183_v61 }
 0x1fc   :  { %1376 = vmatmul.msk.f32.vlgmr.msrb.gmra.mxu0 %vm184_vm8, %v1742_v58 }
 0x200   :  { %v211_v62 = vpop.permute.xlu2 %210 }
 0x201   :  { %1377 = vmatpush.xpose.msk.msra.mxu2 %vm184_vm8, %v211_v62 }
 0x204   :  { %1378 = vmatmul.msk.f32.vlgmr.msra.gmra.mxu2 %vm184_vm8, %v1750_v60 }
 0x208   :  { %v350_v63 = vpop.permute.xlu2 %349 }
 0x209   :  { %1383 = vmatpush.xpose.msk.msrb.mxu2 %vm184_vm8, %v350_v63 }
 0x210   :  { %v348_v0 = vpop.permute.xlu2 %347  ;;  %v322_v1 = vpop.permute.xlu0 %321 }
 0x211   :  { %1381 = vmatpush.xpose.msk.msra.mxu1 %vm184_vm8, %v322_v1  ;;  %1384 = vmatmul.msk.f32.vlgmr.msrb.gmra.mxu2 %vm184_vm8, %v348_v0  ;;  %v320_v2 = vpop.permute.xlu1 %319 }
 0x214   :  { %1382 = vmatmul.msk.f32.vlgmr.msra.gmra.mxu1 %vm184_vm8, %v320_v2 }
 0x279   :  { %v206_v8 = vpop.f32.mrf.mxu0 }
 0x27a   :  { %v236_v9 = vmul.f32 0.25, %v206_v8  ;;  %v466_v8 = vld [vmem:[%s2103_s7 + $0x18] sm:$0xff] }
 0x27b   :  { %489 = vmatpush.msra.mxu2 %v466_v8  ;;  %v618_v8 = vld [vmem:[%s2109_s13 + $0x28] sm:$0xff] }
 0x27c   :  { %v242_v10 = vadd.f32 %v1771_v7, %v236_v9  ;;  %v465_v9 = vld [vmem:[%s2103_s7 + $0x10] sm:$0xff] }
 0x27d   :  { %490 = vmatpush.msra.mxu2 %v465_v9  ;;  %v617_v9 = vld [vmem:[%s2109_s13 + $0x20] sm:$0xff] }
 0x27e   :  { %v245_v11 = vsel %vm244_vm9, %v242_v10, -inf }
 0x27f   :  { %246 = vmax.xlane.f32.xlu2 %v245_v11  ;;  %v463_v11 = vld [vmem:[%s2103_s7] sm:$0xff] }
 0x287   :  { %v233_v15 = vpop.f32.mrf.mxu2 }
 0x288   :  { %v237_v16 = vmul.f32 0.25, %v233_v15 }
 0x28a   :  { %v243_v17 = vadd.f32 %v1775_v14, %v237_v16 }
 0x28c   :  { %v248_v18 = vsel %vm244_vm9, %v243_v17, -inf }
 0x28d   :  { %249 = vmax.xlane.f32.xlu0 %v248_v18  ;;  %v1469_v18 = vld [vmem:[%s2104_s8] ss:$0 sm:$0xff] }
 0x291   :  { %v344_v19 = vpop.f32.mrf.mxu1 }
 0x292   :  { %v375_v20 = vmul.f32 0.25, %v344_v19 }
 0x294   :  { %v372_v21 = vpop.f32.mrf.mxu2  ;;  %v377_v22 = vadd.f32 %v375_v20, %v1771_v7 }
 0x295   :  { %v376_v23 = vmul.f32 0.25, %v372_v21 }
 0x296   :  { %v379_v24 = vsel %vm244_vm9, %v377_v22, -inf }
 0x297   :  { %380 = vmax.xlane.f32.xlu1 %v379_v24  ;;  %v378_v25 = vadd.f32 %v376_v23, %v1775_v14 }
 0x299   :  { %v382_v26 = vsel %vm244_vm9, %v378_v25, -inf }
 0x29a   :  { %383 = vmax.xlane.f32.xlu2 %v382_v26 }
 0x2b0   :  { %1452 = vrot.lane.b32.xlu1 %v1451_v27, %s1580_s24 }
 0x2f2   :  { %v247_v28 = vpop.xlane.xlu2 %246 }
 0x2f3   :  { %v251_v29 = vsub.f32 %v242_v10, %v247_v28  ;;  %v464_v10 = vld [vmem:[%s2103_s7 + $0x8] sm:$0xff] }
 0x2f4   :  { %491 = vmatpush.msra.mxu2 %v464_v10  ;;  %v616_v10 = vld [vmem:[%s2109_s13 + $0x18] sm:$0xff] }
 0x2f5   :  { %v253_v30 = vmul.f32 1.442695, %v251_v29 }
 0x2f6   :  { %492 = vmatpush.msra.mxu2 %v463_v11  ;;  %v615_v11 = vld [vmem:[%s2109_s13 + $0x10] sm:$0xff] }
 0x2f7   :  { %1492 = vpow2.f32 %v253_v30 }
 0x2fd   :  { %v1493_v31 = vpop.eup %1492 }
 0x2fe   :  { %v257_v32 = vsel %vm244_vm9, %v1493_v31, 0.0 }
 0x2ff   :  { %258 = vadd.xlane.f32.xlu0 %v257_v32 }
 0x300   :  { %v250_v33 = vpop.xlane.xlu0 %249 }
 0x301   :  { %v252_v34 = vsub.f32 %v243_v17, %v250_v33 }
 0x303   :  { %v255_v35 = vmul.f32 1.442695, %v252_v34 }
 0x305   :  { %1494 = vpow2.f32 %v255_v35 }
 0x30a   :  { %v381_v36 = vpop.xlane.xlu1 %380 }
 0x30b   :  { %v1495_v37 = vpop.eup %1494  ;;  %v385_v38 = vsub.f32 %v377_v22, %v381_v36  ;;  %v560_v36 = vld [vmem:[%s2107_s11 + $0x10] sm:$0xff] }
 0x30c   :  { %v260_v39 = vsel %vm244_vm9, %v1495_v37, 0.0 }
 0x30d   :  { %v387_v40 = vmul.f32 1.442695, %v385_v38  ;;  %v384_v41 = vpop.xlane.xlu2 %383  ;;  %261 = vadd.xlane.f32.xlu2 %v260_v39  ;;  %v558_v38 = vld [vmem:[%s2107_s11] sm:$0xff] }
 0x30e   :  { %v386_v42 = vsub.f32 %v378_v25, %v384_v41 }
 0x30f   :  { %1496 = vpow2.f32 %v387_v40 }
 0x310   :  { %v389_v43 = vmul.f32 1.442695, %v386_v42 }
 0x312   :  { %1498 = vpow2.f32 %v389_v43 }
 0x315   :  { %v1497_v44 = vpop.eup %1496 }
 0x316   :  { %v391_v45 = vsel %vm244_vm9, %v1497_v44, 0.0 }
 0x317   :  { %392 = vadd.xlane.f32.xlu0 %v391_v45 }
 0x318   :  { %v1499_v46 = vpop.eup %1498 }
 0x319   :  { %v394_v47 = vsel %vm244_vm9, %v1499_v46, 0.0 }
 0x31f   :  { %395 = vadd.xlane.f32.xlu0 %v394_v47 }
 0x322   :  { %v1453_v48 = vpop.permute.xlu1 %1452 }
 0x323   :  { %v1454_v49 = vunpack.i.l.bf16 %v1453_v48  ;;  %v1455_v51 = vunpack.i.h.bf16 %v1453_v48 }
 0x325   :  { %288 = vmatpush.msra.mxu3 %v1454_v49  ;;  %401 = vrot.lane.b32.xlu2 %v1742_v58, %s1581_s2 }
 0x327   :  { %314 = vmatpush.msrb.mxu3 %v1455_v51 }
 0x333   :  { %427 = vrot.lane.b32.xlu0 %v1750_v60, %s1581_s2 }
 0x372   :  { %v259_v52 = vpop.xlane.xlu0 %258 }
 0x373   :  { %1500 = vrcp.f32 %v259_v52 }
 0x379   :  { %v1501_v53 = vpop.eup %1500 }
 0x37a   :  { %v265_v54 = vmul.f32 %v1501_v53, %v1493_v31 }
 0x37c   :  { %1379 = vmatmul.msk.f32.vlgmr.msra.gmra.mxu3 %vm244_vm9, %v265_v54  ;;  %v1470_v54 = vld [vmem:[%s2105_s9] ss:$0 sm:$0xff] }
 0x380   :  { %v262_v56 = vpop.xlane.xlu2 %261 }
 0x381   :  { %1502 = vrcp.f32 %v262_v56 }
 0x387   :  { %v1503_v57 = vpop.eup %1502 }
 0x388   :  { %v402_v59 = vpop.permute.xlu2 %401  ;;  %v266_v61 = vmul.f32 %v1503_v57, %v1495_v37  ;;  %v559_v37 = vld [vmem:[%s2107_s11 + $0x8] sm:$0xff] }
 0x389   :  { %422 = vmatpush.msra.mxu3 %v402_v59 }
 0x38a   :  { %1380 = vmatmul.msk.f32.vlgmr.msrb.gmra.mxu3 %vm244_vm9, %v266_v61  ;;  %v393_v62 = vpop.xlane.xlu0 %392  ;;  %v1471_v61 = vld [vmem:[%s2106_s10] ss:$0 sm:$0xff] }
 0x38b   :  { %1504 = vrcp.f32 %v393_v62 }
 0x391   :  { %v1505_v58 = vpop.eup %1504 }
 0x392   :  { %v399_v63 = vmul.f32 %v1505_v58, %v1497_v44  ;;  %v396_v60 = vpop.xlane.xlu0 %395 }
 0x393   :  { %1506 = vrcp.f32 %v396_v60 }
 0x394   :  { %1385 = vmatmul.msk.f32.vlgmr.msra.gmra.mxu3 %vm244_vm9, %v399_v63 }
 0x399   :  { %v1507_v0 = vpop.eup %1506 }
 0x39a   :  { %v400_v2 = vmul.f32 %v1507_v0, %v1499_v46 }
 0x3a5   :  { %v428_v1 = vpop.permute.xlu0 %427 }
 0x3a6   :  { %448 = vmatpush.msrb.mxu1 %v428_v1 }
 0x3a7   :  { %1386 = vmatmul.msk.f32.vlgmr.msrb.gmra.mxu1 %vm244_vm9, %v400_v2 }
 0x3ff   :  { %v290_v3 = vpop.f32.mrf.mxu3 }
 0x40d   :  { %v316_v4 = vpop.f32.mrf.mxu3 }
 0x417   :  { %v424_v5 = vpop.f32.mrf.mxu3 }
 0x418   :  { %455 = vrot.lane.b32.xlu1 %v424_v5, %s2121_s25  ;;  %v620_v5 = vld [vmem:[%s2109_s13 + $0x38] sm:$0xff] }
 0x419   :  { %640 = vmatpush.msrb.mxu3 %v620_v5 }
 0x424   :  { %v450_v6 = vpop.f32.mrf.mxu1 }
 0x425   :  { %457 = vrot.lane.b32.xlu2 %v450_v6, %s2121_s25  ;;  %v619_v6 = vld [vmem:[%s2109_s13 + $0x30] sm:$0xff] }
 0x426   :  { %641 = vmatpush.msrb.mxu3 %v619_v6 }
 0x428   :  { %642 = vmatpush.msrb.mxu3 %v618_v8 }
 0x42a   :  { %643 = vmatpush.msrb.mxu3 %v617_v9 }
 0x42c   :  { %644 = vmatpush.msrb.mxu3 %v616_v10 }
 0x42e   :  { %645 = vmatpush.msrb.mxu3 %v615_v11 }
 0x47f   :  { %v458_v16 = vpop.permute.xlu2 %457 }
 0x480   :  { %v462_v17 = vsel %vm184_vm8, %v316_v4, %v458_v16  ;;  %v1472_v16 = vld [vmem:[%s2108_s12] ss:$0 sm:$0xff] }
 0x48a   :  { %v456_v12 = vpop.permute.xlu1 %455 }
 0x48b   :  { %v461_v15 = vsel %vm184_vm8, %v290_v3, %v456_v12  ;;  %v614_v12 = vld [vmem:[%s2109_s13 + $0x8] sm:$0xff] }
 0x48c   :  { %1387 = vmatmul.msk.f32.vlgmr.msra.gmra.mxu2 %vm76_vm0, %v461_v15  ;;  %646 = vmatpush.msrb.mxu3 %v614_v12  ;;  %v613_v15 = vld [vmem:[%s2109_s13] sm:$0xff] }
 0x48e   :  { %647 = vmatpush.msrb.mxu3 %v613_v15  ;;  %v1474_v15 = vld [vmem:[%s2111_s15] ss:$0 sm:$0xff] }
 0x494   :  { %1388 = vmatmul.msk.f32.gmra.mxu2 %vm76_vm0, %v462_v17 }
 0x50f   :  { %v494_v19 = vpop.f32.mrf.mxu2 }
 0x510   :  { %v495_v20 = vadd.f32 %v1469_v18, %v494_v19 }
 0x512   :  { %v500_v21 = vadd.f32 %v495_v20, %v1731_v50 }
 0x514   :  { %v504_v22 = vsel %vm76_vm0, %v500_v21, 0.0 }
 0x515   :  { %505 = vadd.xlane.f32.xlu1 %v504_v22 }
 0x517   :  { %v497_v23 = vpop.f32.mrf.mxu2 }
 0x518   :  { %v498_v24 = vadd.f32 %v1469_v18, %v497_v23 }
 0x51a   :  { %v501_v25 = vadd.f32 %v498_v24, %v1735_v55  ;;  %v561_v55 = vld [vmem:[%s2107_s11 + $0x18] sm:$0xff] }
 0x51b   :  { %584 = vmatpush.msra.mxu0 %v561_v55 }
 0x51c   :  { %v507_v26 = vsel %vm76_vm0, %v501_v25, 0.0 }
 0x51d   :  { %508 = vadd.xlane.f32.xlu2 %v507_v26  ;;  %585 = vmatpush.msra.mxu0 %v560_v36 }
 0x51f   :  { %586 = vmatpush.msra.mxu0 %v559_v37  ;;  %v1473_v37 = vld [vmem:[%s2110_s14] ss:$0 sm:$0xff] }
 0x521   :  { %587 = vmatpush.msra.mxu0 %v558_v38 }
 0x588   :  { %v506_v27 = vpop.xlane.xlu1 %505 }
 0x589   :  { %v510_v28 = vmul.f32 %v506_v27, %v1705_v13 }
 0x58b   :  { %v512_v29 = vsub.f32 %v500_v21, %v510_v28 }
 0x58d   :  { %v514_v30 = vmul.f32 %v512_v29, %v512_v29 }
 0x58f   :  { %v516_v31 = vsel %vm76_vm0, %v514_v30, 0.0 }
 0x590   :  { %517 = vadd.xlane.f32.xlu0 %v516_v31  ;;  %v509_v32 = vpop.xlane.xlu2 %508 }
 0x591   :  { %v511_v50 = vmul.f32 %v509_v32, %v1705_v13 }
 0x593   :  { %v513_v33 = vsub.f32 %v501_v25, %v511_v50 }
 0x595   :  { %v515_v34 = vmul.f32 %v513_v33, %v513_v33 }
 0x597   :  { %v519_v35 = vsel %vm76_vm0, %v515_v34, 0.0 }
 0x598   :  { %520 = vadd.xlane.f32.xlu1 %v519_v35 }
 0x603   :  { %v518_v39 = vpop.xlane.xlu0 %517 }
 0x604   :  { %v522_v40 = vmul.f32 %v518_v39, %v1705_v13 }
 0x606   :  { %v524_v41 = vadd.f32 1e-12, %v522_v40 }
 0x608   :  { %1508 = vrsqrt.f32 %v524_v41  ;;  %vm532_vm11 = vweird.f32 %v524_v41 }
 0x60b   :  { %v521_v42 = vpop.xlane.xlu1 %520 }
 0x60c   :  { %v523_v43 = vmul.f32 %v521_v42, %v1705_v13 }
 0x60e   :  { %v1509_v44 = vpop.eup %1508  ;;  %v525_v45 = vadd.f32 1e-12, %v523_v43 }
 0x60f   :  { %v527_v46 = vmul.f32 %v1509_v44, %v524_v41  ;;  %vm533_vm10 = vweird.f32 %v1509_v44 }
 0x610   :  { %1510 = vrsqrt.f32 %v525_v45  ;;  %vm534_vm12 = vmor %vm532_vm11, %vm533_vm10  ;;  %vm542_vm14 = vweird.f32 %v525_v45 }
 0x611   :  { %v528_v47 = vmul.f32 %v1509_v44, %v527_v46 }
 0x613   :  { %v529_v48 = vmul.f32 0.5, %v528_v47 }
 0x615   :  { %v530_v49 = vsub.f32 1.5, %v529_v48 }
 0x616   :  { %v1511_v51 = vpop.eup %1510 }
 0x617   :  { %v531_v52 = vmul.f32 %v1509_v44, %v530_v49  ;;  %v537_v53 = vmul.f32 %v1511_v51, %v525_v45  ;;  %vm543_vm13 = vweird.f32 %v1511_v51 }
 0x618   :  { %vm544_vm15 = vmor %vm542_vm14, %vm543_vm13 }
 0x619   :  { %v535_v56 = vsel %vm534_vm12, %v1509_v44, %v531_v52  ;;  %v538_v57 = vmul.f32 %v1511_v51, %v537_v53 }
 0x61a   :  { %v546_v59 = vmul.f32 %v535_v56, %v512_v29 }
 0x61b   :  { %v539_v62 = vmul.f32 0.5, %v538_v57 }
 0x61c   :  { %v551_v58 = vmul.f32 %v1470_v54, %v546_v59  ;;  %v1396_v59 = vld [vmem:[%s2132_s4 + $0x38] sm:$0xff] }
 0x61d   :  { %v540_v63 = vsub.f32 1.5, %v539_v62  ;;  %741 = vmatpush.msra.mxu1 %v1396_v59  ;;  %v1394_v62 = vld [vmem:[%s2132_s4 + $0x28] sm:$0xff] }
 0x61e   :  { %v556_v60 = vadd.f32 %v1471_v61, %v551_v58  ;;  %v1393_v58 = vld [vmem:[%s2132_s4 + $0x20] sm:$0xff] }
 0x61f   :  { %v541_v0 = vmul.f32 %v1511_v51, %v540_v63 }
 0x620   :  { %1389 = vmatmul.msk.f32.vlgmr.msra.gmra.mxu0 %vm76_vm0, %v556_v60 }
 0x621   :  { %v545_v1 = vsel %vm544_vm15, %v1511_v51, %v541_v0 }
 0x622   :  { %v547_v2 = vmul.f32 %v545_v1, %v513_v33 }
 0x624   :  { %v552_v3 = vmul.f32 %v1470_v54, %v547_v2 }
 0x626   :  { %v557_v4 = vadd.f32 %v1471_v61, %v552_v3  ;;  %v1395_v61 = vld [vmem:[%s2132_s4 + $0x30] sm:$0xff] }
 0x627   :  { %742 = vmatpush.msra.mxu1 %v1395_v61 }
 0x628   :  { %1390 = vmatmul.msk.f32.gmra.mxu0 %vm76_vm0, %v557_v4 }
 0x629   :  { %743 = vmatpush.msra.mxu1 %v1394_v62 }
 0x62b   :  { %744 = vmatpush.msra.mxu1 %v1393_v58 }
 0x69d   :  { %v589_v17 = vpop.f32.mrf.mxu0 }
 0x69e   :  { %v590_v18 = vadd.f32 %v1472_v16, %v589_v17 }
 0x6a0   :  { %v595_v19 = vmul.f32 %v590_v18, %v590_v18 }
 0x6a2   :  { %v597_v20 = vmul.f32 %v595_v19, %v590_v18  ;;  %v1475_v19 = vld [vmem:[%s2136_s16] ss:$0 sm:$0xff] }
 0x6a4   :  { %v599_v21 = vmul.f32 0.044715, %v597_v20 }
 0x6a5   :  { %v592_v22 = vpop.f32.mrf.mxu0 }
 0x6a6   :  { %v601_v23 = vadd.f32 %v599_v21, %v590_v18  ;;  %v593_v24 = vadd.f32 %v1472_v16, %v592_v22 }
 0x6a8   :  { %v603_v25 = vmul.f32 0.7978846, %v601_v23  ;;  %v596_v26 = vmul.f32 %v593_v24, %v593_v24 }
 0x6aa   :  { %1512 = vtanh.f32 %v603_v25  ;;  %v598_v27 = vmul.f32 %v596_v26, %v593_v24 }
 0x6ac   :  { %v600_v28 = vmul.f32 0.044715, %v598_v27 }
 0x6ae   :  { %v602_v29 = vadd.f32 %v600_v28, %v593_v24 }
 0x6b0   :  { %v1513_v30 = vpop.eup %1512  ;;  %v604_v31 = vmul.f32 0.7978846, %v602_v29  ;;  %v1476_v29 = vld [vmem:[%s2102_s6 + $0x1] ss:$0 sm:$0xff] }
 0x6b1   :  { %v607_v32 = vadd.f32 1.0, %v1513_v30 }
 0x6b2   :  { %1514 = vtanh.f32 %v604_v31 }
 0x6b3   :  { %v609_v50 = vmul.f32 0.5, %v607_v32 }
 0x6b5   :  { %v611_v33 = vmul.f32 %v609_v50, %v590_v18 }
 0x6b7   :  { %1391 = vmatmul.msk.f32.vlgmr.msrb.gmra.mxu3 %vm625_vm1, %v611_v33 }
 0x6b8   :  { %v1515_v34 = vpop.eup %1514 }
 0x6b9   :  { %v608_v35 = vadd.f32 1.0, %v1515_v34 }
 0x6bb   :  { %v610_v55 = vmul.f32 0.5, %v608_v35 }
 0x6bd   :  { %v612_v36 = vmul.f32 %v610_v55, %v593_v24 }
 0x6bf   :  { %1392 = vmatmul.msk.f32.gmra.mxu3 %vm625_vm1, %v612_v36 }
 0x73a   :  { %v649_v38 = vpop.f32.mrf.mxu3 }
 0x73b   :  { %v650_v39 = vadd.f32 %v1473_v37, %v649_v38 }
 0x73d   :  { %v655_v40 = vadd.f32 %v650_v39, %v556_v60 }
 0x73f   :  { %v659_v41 = vsel %vm76_vm0, %v655_v40, 0.0 }
 0x740   :  { %660 = vadd.xlane.f32.xlu2 %v659_v41 }
 0x742   :  { %v652_v42 = vpop.f32.mrf.mxu3 }
 0x743   :  { %v653_v43 = vadd.f32 %v1473_v37, %v652_v42 }
 0x745   :  { %v656_v44 = vadd.f32 %v653_v43, %v557_v4 }
 0x747   :  { %v662_v45 = vsel %vm76_vm0, %v656_v44, 0.0 }
 0x748   :  { %663 = vadd.xlane.f32.xlu0 %v662_v45 }
 0x7b3   :  { %v661_v46 = vpop.xlane.xlu2 %660 }
 0x7b4   :  { %v665_v47 = vmul.f32 %v661_v46, %v1705_v13 }
 0x7b6   :  { %v667_v48 = vsub.f32 %v655_v40, %v665_v47 }
 0x7b8   :  { %v669_v49 = vmul.f32 %v667_v48, %v667_v48 }
 0x7ba   :  { %v671_v51 = vsel %vm76_vm0, %v669_v49, 0.0 }
 0x7bb   :  { %v664_v52 = vpop.xlane.xlu0 %663  ;;  %672 = vadd.xlane.f32.xlu1 %v671_v51 }
 0x7bc   :  { %v666_v53 = vmul.f32 %v664_v52, %v1705_v13 }
 0x7be   :  { %v668_v54 = vsub.f32 %v656_v44, %v666_v53 }
 0x7c0   :  { %v670_v56 = vmul.f32 %v668_v54, %v668_v54 }
 0x7c2   :  { %v674_v57 = vsel %vm76_vm0, %v670_v56, 0.0 }
 0x7c3   :  { %675 = vadd.xlane.f32.xlu2 %v674_v57 }
 0x82e   :  { %v673_v63 = vpop.xlane.xlu1 %672 }
 0x82f   :  { %v677_v60 = vmul.f32 %v673_v63, %v1705_v13 }
 0x831   :  { %v679_v0 = vadd.f32 1e-12, %v677_v60 }
 0x833   :  { %1516 = vrsqrt.f32 %v679_v0  ;;  %vm687_vm3 = vweird.f32 %v679_v0 }
 0x836   :  { %v676_v1 = vpop.xlane.xlu2 %675 }
 0x837   :  { %v678_v2 = vmul.f32 %v676_v1, %v1705_v13 }
 0x839   :  { %v1517_v3 = vpop.eup %1516  ;;  %v680_v4 = vadd.f32 1e-12, %v678_v2 }
 0x83a   :  { %v682_v5 = vmul.f32 %v1517_v3, %v679_v0  ;;  %vm688_vm2 = vweird.f32 %v1517_v3 }
 0x83b   :  { %1518 = vrsqrt.f32 %v680_v4  ;;  %vm689_vm4 = vmor %vm687_vm3, %vm688_vm2  ;;  %vm697_vm6 = vweird.f32 %v680_v4 }
 0x83c   :  { %v683_v6 = vmul.f32 %v1517_v3, %v682_v5 }
 0x83e   :  { %v684_v8 = vmul.f32 0.5, %v683_v6 }
 0x840   :  { %v685_v9 = vsub.f32 1.5, %v684_v8 }
 0x841   :  { %v1519_v10 = vpop.eup %1518 }
 0x842   :  { %v686_v11 = vmul.f32 %v1517_v3, %v685_v9  ;;  %v692_v12 = vmul.f32 %v1519_v10, %v680_v4  ;;  %vm698_vm5 = vweird.f32 %v1519_v10 }
 0x843   :  { %vm699_vm7 = vmor %vm697_vm6, %vm698_vm5  ;;  %vm1290_vm5 = vcmask 1040384   ;;  %vm1355_vm6 = vcmask 17408  }
 0x844   :  { %v690_v16 = vsel %vm689_vm4, %v1517_v3, %v686_v11  ;;  %v693_v17 = vmul.f32 %v1519_v10, %v692_v12 }
 0x845   :  { %v701_v18 = vmul.f32 %v690_v16, %v667_v48 }
 0x846   :  { %v694_v20 = vmul.f32 0.5, %v693_v17 }
 0x847   :  { %v706_v21 = vmul.f32 %v1474_v15, %v701_v18 }
 0x848   :  { %v695_v22 = vsub.f32 1.5, %v694_v20 }
 0x849   :  { %v1907_v23 = vadd.f32 %v1475_v19, %v706_v21 }
 0x84a   :  { %v696_v24 = vmul.f32 %v1519_v10, %v695_v22 }
 0x84b   :  { %1398 = vmatmul.msk.f32.vlgmr.msra.gmra.mxu1 %vm76_vm0, %v1907_v23 }
 0x84c   :  { %v700_v25 = vsel %vm699_vm7, %v1519_v10, %v696_v24 }
 0x84d   :  { %v702_v26 = vmul.f32 %v700_v25, %v668_v54 }
 0x84f   :  { %v707_v27 = vmul.f32 %v1474_v15, %v702_v26 }
 0x851   :  { %v1911_v28 = vadd.f32 %v1475_v19, %v707_v27 }
 0x853   :  { %1399 = vmatmul.msk.f32.gmra.mxu1 %vm76_vm0, %v1911_v28 }
 0x8c8   :  { %v746_v30 = vpop.f32.mrf.mxu1 }
 0x8c9   :  { %v1918_v31 = vadd.f32 %v1476_v29, %v746_v30 }
 0x8cb   :  { %753 = vrot.lane.b32.xlu0 %v1918_v31, %s1578_s30 }
 0x8d0   :  { %v749_v32 = vpop.f32.mrf.mxu1 }
 0x8d1   :  { %v1922_v50 = vadd.f32 %v1476_v29, %v749_v32 }
 0x8d3   :  { %912 = vrot.lane.b32.xlu0 %v1922_v50, %s1579_s5  ;;  %914 = vrot.lane.b32.xlu2 %v1922_v50, %s1577_s0  ;;  %v1456_v11 = vpack.i.bf16 %v1922_v50, %v1918_v31 }
 0x8d4   :  { %780 = vrot.lane.b32.xlu1 %v1922_v50, %s1578_s30 }
 0x8db   :  { %884 = vrot.lane.b32.xlu0 %v1918_v31, %s1579_s5 }
 0x8dc   :  { %886 = vrot.lane.b32.xlu1 %v1918_v31, %s1577_s0 }
 0x92d   :  { %v915_v33 = vpop.permute.xlu2 %914 }
 0x92e   :  { %1408 = vmatpush.xpose.msk.msra.mxu3 %vm184_vm8, %v915_v33  ;;  %v1415_v33 = vld [vmem:[%s2103_s7 + $0x38] sm:$0xff] }
 0x93d   :  { %v754_v34 = vpop.permute.xlu0 %753 }
 0x93e   :  { %1400 = vmatpush.xpose.msk.msrb.mxu2 %vm184_vm8, %v754_v34  ;;  %v1414_v34 = vld [vmem:[%s2103_s7 + $0x30] sm:$0xff] }
 0x941   :  { %1401 = vmatmul.msk.f32.vlgmr.msrb.gmra.mxu2 %vm184_vm8, %v1918_v31 }
 0x945   :  { %v913_v35 = vpop.permute.xlu0 %912 }
 0x946   :  { %v781_v55 = vpop.permute.xlu1 %780  ;;  %1409 = vmatmul.msk.f32.vlgmr.msra.gmra.mxu3 %vm184_vm8, %v913_v35  ;;  %v1413_v35 = vld [vmem:[%s2103_s7 + $0x28] sm:$0xff] }
 0x947   :  { %1402 = vmatpush.xpose.msk.msrb.mxu0 %vm184_vm8, %v781_v55 }
 0x94a   :  { %1403 = vmatmul.msk.f32.vlgmr.msrb.gmra.mxu0 %vm184_vm8, %v1922_v50 }
 0x94d   :  { %v885_v37 = vpop.permute.xlu0 %884 }
 0x94e   :  { %v887_v36 = vpop.permute.xlu1 %886 }
 0x94f   :  { %1406 = vmatpush.xpose.msk.msra.mxu0 %vm184_vm8, %v887_v36 }
 0x952   :  { %1407 = vmatmul.msk.f32.vlgmr.msra.gmra.mxu0 %vm184_vm8, %v885_v37 }
 0x953   :  { %1056 = vmatpush.msrb.mxu0 %v1415_v33  ;;  %v1435_v33 = vld [vmem:[%s2109_s13 + $0x78] sm:$0xff] }
 0x955   :  { %1057 = vmatpush.msrb.mxu0 %v1414_v34  ;;  %v1434_v34 = vld [vmem:[%s2109_s13 + $0x70] sm:$0xff] }
 0x957   :  { %1058 = vmatpush.msrb.mxu0 %v1413_v35  ;;  %v1433_v35 = vld [vmem:[%s2109_s13 + $0x68] sm:$0xff] }
 0x9c4   :  { %v776_v38 = vpop.f32.mrf.mxu2 }
 0x9c5   :  { %v806_v39 = vmul.f32 0.25, %v776_v38 }
 0x9c7   :  { %v803_v40 = vpop.f32.mrf.mxu0  ;;  %v808_v41 = vadd.f32 %v806_v39, %v1771_v7  ;;  %v1412_v39 = vld [vmem:[%s2103_s7 + $0x20] sm:$0xff] }
 0x9c8   :  { %v807_v42 = vmul.f32 0.25, %v803_v40  ;;  %1059 = vmatpush.msrb.mxu0 %v1412_v39  ;;  %v1428_v39 = vld [vmem:[%s2109_s13 + $0x40] sm:$0xff] }
 0x9c9   :  { %v937_v43 = vpop.f32.mrf.mxu3  ;;  %v810_v44 = vsel %vm244_vm9, %v808_v41, -inf }
 0x9ca   :  { %v941_v45 = vmul.f32 0.25, %v937_v43  ;;  %811 = vmax.xlane.f32.xlu2 %v810_v44  ;;  %v809_v46 = vadd.f32 %v807_v42, %v1775_v14  ;;  %v1477_v44 = vld [vmem:[%s2104_s8 + $0x1] ss:$0 sm:$0xff] }
 0x9cc   :  { %v813_v47 = vsel %vm244_vm9, %v809_v46, -inf  ;;  %v943_v48 = vadd.f32 %v941_v45, %v1775_v14 }
 0x9cd   :  { %814 = vmax.xlane.f32.xlu1 %v813_v47 }
 0x9ce   :  { %v947_v52 = vsel %vm244_vm9, %v943_v48, -inf }
 0x9cf   :  { %v909_v49 = vpop.f32.mrf.mxu0 }
 0x9d0   :  { %v940_v51 = vmul.f32 0.25, %v909_v49 }
 0x9d2   :  { %948 = vmax.xlane.f32.xlu2 %v947_v52  ;;  %v942_v53 = vadd.f32 %v940_v51, %v1771_v7 }
 0x9d4   :  { %v944_v54 = vsel %vm244_vm9, %v942_v53, -inf }
 0x9d5   :  { %945 = vmax.xlane.f32.xlu0 %v944_v54 }
 0xa3d   :  { %v812_v56 = vpop.xlane.xlu2 %811 }
 0xa3e   :  { %v816_v57 = vsub.f32 %v808_v41, %v812_v56 }
 0xa40   :  { %v818_v59 = vmul.f32 1.442695, %v816_v57  ;;  %v815_v61 = vpop.xlane.xlu1 %814 }
 0xa41   :  { %v817_v62 = vsub.f32 %v809_v46, %v815_v61 }
 0xa42   :  { %1520 = vpow2.f32 %v818_v59 }
 0xa43   :  { %v820_v58 = vmul.f32 1.442695, %v817_v62 }
 0xa45   :  { %1522 = vpow2.f32 %v820_v58  ;;  %v949_v63 = vpop.xlane.xlu2 %948 }
 0xa46   :  { %v951_v14 = vsub.f32 %v943_v48, %v949_v63 }
 0xa48   :  { %v1521_v60 = vpop.eup %1520  ;;  %v954_v0 = vmul.f32 1.442695, %v951_v14  ;;  %v946_v1 = vpop.xlane.xlu0 %945 }
 0xa49   :  { %v950_v2 = vsub.f32 %v942_v53, %v946_v1  ;;  %v822_v3 = vsel %vm244_vm9, %v1521_v60, 0.0  ;;  %v1421_v1 = vld [vmem:[%s2107_s11 + $0x20] sm:$0xff] }
 0xa4a   :  { %823 = vadd.xlane.f32.xlu1 %v822_v3  ;;  %1524 = vpow2.f32 %v954_v0  ;;  %v1422_v0 = vld [vmem:[%s2107_s11 + $0x28] sm:$0xff] }
 0xa4b   :  { %v1523_v7 = vpop.eup %1522  ;;  %v952_v4 = vmul.f32 1.442695, %v950_v2 }
 0xa4c   :  { %v825_v5 = vsel %vm244_vm9, %v1523_v7, 0.0 }
 0xa4d   :  { %1526 = vpow2.f32 %v952_v4  ;;  %826 = vadd.xlane.f32.xlu0 %v825_v5 }
 0xa50   :  { %v1525_v6 = vpop.eup %1524 }
 0xa51   :  { %v959_v10 = vsel %vm244_vm9, %v1525_v6, 0.0 }
 0xa53   :  { %v1527_v8 = vpop.eup %1526 }
 0xa54   :  { %v956_v9 = vsel %vm244_vm9, %v1527_v8, 0.0 }
 0xa55   :  { %957 = vadd.xlane.f32.xlu2 %v956_v9  ;;  %960 = vadd.xlane.f32.xlu0 %v959_v10 }
 0xa63   :  { %1457 = vrot.lane.b32.xlu1 %v1456_v11, %s1580_s24 }
 0xa6d   :  { %1462 = vrot.lane.b32.xlu2 %v1456_v11, %s1581_s2 }
 0xabd   :  { %v824_v15 = vpop.xlane.xlu1 %823 }
 0xabe   :  { %1528 = vrcp.f32 %v824_v15 }
 0xac0   :  { %v827_v12 = vpop.xlane.xlu0 %826 }
 0xac1   :  { %1530 = vrcp.f32 %v827_v12 }
 0xac4   :  { %v1529_v17 = vpop.eup %1528 }
 0xac5   :  { %v830_v25 = vmul.f32 %v1529_v17, %v1521_v60  ;;  %v1423_v60 = vld [vmem:[%s2107_s11 + $0x30] sm:$0xff] }
 0xac7   :  { %v1531_v19 = vpop.eup %1530 }
 0xac8   :  { %v958_v16 = vpop.xlane.xlu2 %957  ;;  %v961_v18 = vpop.xlane.xlu0 %960  ;;  %v831_v26 = vmul.f32 %v1531_v19, %v1523_v7 }
 0xac9   :  { %1532 = vrcp.f32 %v958_v16 }
 0xaca   :  { %1534 = vrcp.f32 %v961_v18  ;;  %v1478_v18 = vld [vmem:[%s2105_s9 + $0x1] ss:$0 sm:$0xff] }
 0xacf   :  { %v1533_v30 = vpop.eup %1532 }
 0xad0   :  { %v1463_v20 = vpop.permute.xlu2 %1462  ;;  %v1535_v31 = vpop.eup %1534  ;;  %v964_v32 = vmul.f32 %v1533_v30, %v1527_v8 }
 0xad1   :  { %v1465_v27 = vunpack.i.h.bf16 %v1463_v20  ;;  %v1464_v29 = vunpack.i.l.bf16 %v1463_v20  ;;  %v965_v50 = vmul.f32 %v1535_v31, %v1525_v6 }
 0xad5   :  { %v1458_v21 = vpop.permute.xlu1 %1457 }
 0xad6   :  { %v1460_v22 = vunpack.i.h.bf16 %v1458_v21  ;;  %v1459_v24 = vunpack.i.l.bf16 %v1458_v21 }
 0xad8   :  { %853 = vmatpush.msrb.mxu1 %v1459_v24  ;;  %879 = vmatpush.msra.mxu2 %v1460_v22  ;;  %v1479_v22 = vld [vmem:[%s2106_s10 + $0x1] ss:$0 sm:$0xff] }
 0xad9   :  { %1404 = vmatmul.msk.f32.vlgmr.msrb.gmra.mxu1 %vm244_vm9, %v830_v25  ;;  %1405 = vmatmul.msk.f32.vlgmr.msra.gmra.mxu2 %vm244_vm9, %v831_v26 }
 0xada   :  { %987 = vmatpush.msra.mxu1 %v1464_v29  ;;  %1013 = vmatpush.msrb.mxu2 %v1465_v27 }
 0xadc   :  { %1212 = vmatpush.msrb.mxu1 %v1435_v33 }
 0xade   :  { %1213 = vmatpush.msrb.mxu1 %v1434_v34 }
 0xae0   :  { %1214 = vmatpush.msrb.mxu1 %v1433_v35 }
 0xae1   :  { %1410 = vmatmul.msk.f32.vlgmr.msra.gmra.mxu1 %vm244_vm9, %v964_v32  ;;  %1411 = vmatmul.msk.f32.vlgmr.msrb.gmra.mxu2 %vm244_vm9, %v965_v50 }
 0xb56   :  { %v855_v55 = vpop.f32.mrf.mxu1 }
 0xb5c   :  { %v881_v36 = vpop.f32.mrf.mxu2 }
 0xb5e   :  { %v989_v37 = vpop.f32.mrf.mxu1 }
 0xb5f   :  { %1020 = vrot.lane.b32.xlu0 %v989_v37, %s2137_s1  ;;  %v1430_v37 = vld [vmem:[%s2109_s13 + $0x50] sm:$0xff] }
 0xb64   :  { %v1015_v38 = vpop.f32.mrf.mxu2 }
 0xb65   :  { %1022 = vrot.lane.b32.xlu1 %v1015_v38, %s2137_s1  ;;  %v1429_v38 = vld [vmem:[%s2109_s13 + $0x48] sm:$0xff] }
 0xbd1   :  { %v1021_v40 = vpop.permute.xlu0 %1020 }
 0xbd2   :  { %v1026_v41 = vsel %vm184_vm8, %v855_v55, %v1021_v40  ;;  %v1432_v55 = vld [vmem:[%s2109_s13 + $0x60] sm:$0xff] }
 0xbd3   :  { %1417 = vmatmul.msk.f32.vlgmr.msrb.gmra.mxu0 %vm76_vm0, %v1026_v41  ;;  %1215 = vmatpush.msrb.mxu1 %v1432_v55  ;;  %v1480_v40 = vld [vmem:[%s2108_s12 + $0x1] ss:$0 sm:$0xff] }
 0xbd7   :  { %v1023_v42 = vpop.permute.xlu1 %1022 }
 0xbd8   :  { %v1027_v43 = vsel %vm184_vm8, %v881_v36, %v1023_v42  ;;  %v1431_v36 = vld [vmem:[%s2109_s13 + $0x58] sm:$0xff] }
 0xbd9   :  { %1216 = vmatpush.msrb.mxu1 %v1431_v36 }
 0xbdb   :  { %1418 = vmatmul.msk.f32.gmra.mxu0 %vm76_vm0, %v1027_v43  ;;  %1217 = vmatpush.msrb.mxu1 %v1430_v37 }
 0xbdd   :  { %1218 = vmatpush.msrb.mxu1 %v1429_v38 }
 0xbdf   :  { %1219 = vmatpush.msrb.mxu1 %v1428_v39 }
 0xc50   :  { %v1061_v45 = vpop.f32.mrf.mxu0 }
 0xc51   :  { %v1062_v46 = vadd.f32 %v1477_v44, %v1061_v45 }
 0xc53   :  { %v1067_v47 = vadd.f32 %v1062_v46, %v1907_v23 }
 0xc55   :  { %v1073_v48 = vsel %vm76_vm0, %v1067_v47, 0.0 }
 0xc56   :  { %1074 = vadd.xlane.f32.xlu2 %v1073_v48 }
 0xc58   :  { %v1064_v49 = vpop.f32.mrf.mxu0 }
 0xc59   :  { %v1065_v51 = vadd.f32 %v1477_v44, %v1064_v49 }
 0xc5b   :  { %v1068_v52 = vadd.f32 %v1065_v51, %v1911_v28  ;;  %v1424_v28 = vld [vmem:[%s2107_s11 + $0x38] sm:$0xff]  ;;  %s1583_s11 = smov [#allocation2]  }
 0xc5c   :  { %1155 = vmatpush.msrb.mxu3 %v1424_v28  ;;  %v1481_v28 = vld [vmem:[%s2110_s14 + $0x1] ss:$0 sm:$0xff]  ;;  %s1362_s12 = sshll.u32 %s1583_s11, 4  ;;  %s1364_s14 = sshll.u32 %s2117_s21, 4  ;;  %s1363_s12 = int_to_ptr.vmem [resolvable:$true] %s1362_s12  ;;  %s1365_s14 = int_to_ptr.hbm [resolvable:$true] %s1364_s14 }
 0xc5d   :  { %v1076_v53 = vsel %vm76_vm0, %v1068_v52, 0.0 }
 0xc5e   :  { %1077 = vadd.xlane.f32.xlu0 %v1076_v53  ;;  %1156 = vmatpush.msrb.mxu3 %v1423_v60 }
 0xc60   :  { %1157 = vmatpush.msrb.mxu3 %v1422_v0 }
 0xc62   :  { %1158 = vmatpush.msrb.mxu3 %v1421_v1 }
 0xcc9   :  { %v1075_v54 = vpop.xlane.xlu2 %1074 }
 0xcca   :  { %v1079_v56 = vmul.f32 %v1075_v54, %v1705_v13 }
 0xccc   :  { %v1081_v57 = vsub.f32 %v1067_v47, %v1079_v56 }
 0xcce   :  { %v1083_v59 = vmul.f32 %v1081_v57, %v1081_v57 }
 0xcd0   :  { %v1085_v61 = vsel %vm76_vm0, %v1083_v59, 0.0 }
 0xcd1   :  { %v1078_v62 = vpop.xlane.xlu0 %1077  ;;  %1086 = vadd.xlane.f32.xlu1 %v1085_v61 }
 0xcd2   :  { %v1080_v23 = vmul.f32 %v1078_v62, %v1705_v13 }
 0xcd4   :  { %v1082_v58 = vsub.f32 %v1068_v52, %v1080_v23 }
 0xcd6   :  { %v1084_v63 = vmul.f32 %v1082_v58, %v1082_v58 }
 0xcd8   :  { %v1088_v14 = vsel %vm76_vm0, %v1084_v63, 0.0 }
 0xcd9   :  { %1089 = vadd.xlane.f32.xlu2 %v1088_v14 }
 0xd44   :  { %v1087_v2 = vpop.xlane.xlu1 %1086 }
 0xd45   :  { %v1091_v3 = vmul.f32 %v1087_v2, %v1705_v13 }
 0xd47   :  { %v1093_v7 = vadd.f32 1e-12, %v1091_v3 }
 0xd49   :  { %1536 = vrsqrt.f32 %v1093_v7  ;;  %vm1101_vm9 = vweird.f32 %v1093_v7 }
 0xd4c   :  { %v1090_v4 = vpop.xlane.xlu2 %1089 }
 0xd4d   :  { %v1092_v5 = vmul.f32 %v1090_v4, %v1705_v13 }
 0xd4f   :  { %v1537_v6 = vpop.eup %1536  ;;  %v1094_v8 = vadd.f32 1e-12, %v1092_v5 }
 0xd50   :  { %v1096_v9 = vmul.f32 %v1537_v6, %v1093_v7  ;;  %vm1102_vm8 = vweird.f32 %v1537_v6 }
 0xd51   :  { %1538 = vrsqrt.f32 %v1094_v8  ;;  %vm1103_vm10 = vmor %vm1101_vm9, %vm1102_vm8  ;;  %vm1111_vm12 = vweird.f32 %v1094_v8 }
 0xd52   :  { %v1097_v10 = vmul.f32 %v1537_v6, %v1096_v9 }
 0xd54   :  { %v1098_v11 = vmul.f32 0.5, %v1097_v10 }
 0xd56   :  { %v1099_v12 = vsub.f32 1.5, %v1098_v11 }
 0xd57   :  { %v1539_v15 = vpop.eup %1538 }
 0xd58   :  { %v1100_v16 = vmul.f32 %v1537_v6, %v1099_v12  ;;  %v1106_v17 = vmul.f32 %v1539_v15, %v1094_v8  ;;  %vm1112_vm11 = vweird.f32 %v1539_v15 }
 0xd59   :  { %vm1113_vm13 = vmor %vm1111_vm12, %vm1112_vm11 }
 0xd5a   :  { %v1104_v19 = vsel %vm1103_vm10, %v1537_v6, %v1100_v16  ;;  %v1107_v20 = vmul.f32 %v1539_v15, %v1106_v17 }
 0xd5b   :  { %v1115_v21 = vmul.f32 %v1104_v19, %v1081_v57 }
 0xd5c   :  { %v1108_v24 = vmul.f32 0.5, %v1107_v20 }
 0xd5d   :  { %v1120_v25 = vmul.f32 %v1478_v18, %v1115_v21  ;;  %v1295_v21 = vld [vmem:[%s2113_s17 + $0x18] sm:$0xff] }
 0xd5e   :  { %v1109_v26 = vsub.f32 1.5, %v1108_v24  ;;  %1315 = vmatpush.msra.mxu2 %v1295_v21 }
 0xd5f   :  { %v1125_v27 = vadd.f32 %v1479_v22, %v1120_v25  ;;  %v1293_v25 = vld [vmem:[%s2113_s17 + $0x8] sm:$0xff] }
 0xd60   :  { %v1110_v29 = vmul.f32 %v1539_v15, %v1109_v26  ;;  %v1292_v26 = vld [vmem:[%s2113_s17] sm:$0xff] }
 0xd61   :  { %1426 = vmatmul.msk.f32.vlgmr.msrb.gmra.mxu3 %vm76_vm0, %v1125_v27 }
 0xd62   :  { %v1114_v30 = vsel %vm1113_vm13, %v1539_v15, %v1110_v29 }
 0xd63   :  { %v1116_v31 = vmul.f32 %v1114_v30, %v1082_v58 }
 0xd65   :  { %v1121_v32 = vmul.f32 %v1478_v18, %v1116_v31 }
 0xd67   :  { %v1126_v50 = vadd.f32 %v1479_v22, %v1121_v32  ;;  %v1294_v22 = vld [vmem:[%s2113_s17 + $0x10] sm:$0xff] }
 0xd68   :  { %1316 = vmatpush.msra.mxu2 %v1294_v22 }
 0xd69   :  { %1427 = vmatmul.msk.f32.gmra.mxu3 %vm76_vm0, %v1126_v50 }
 0xd6a   :  { %1317 = vmatpush.msra.mxu2 %v1293_v25 }
 0xd6c   :  { %1318 = vmatpush.msra.mxu2 %v1292_v26 }
 0xde4   :  { %v1160_v41 = vpop.f32.mrf.mxu3 }
 0xde5   :  { %v1161_v42 = vadd.f32 %v1480_v40, %v1160_v41 }
 0xde7   :  { %v1166_v43 = vmul.f32 %v1161_v42, %v1161_v42 }
 0xde9   :  { %v1168_v44 = vmul.f32 %v1166_v43, %v1161_v42 }
 0xdeb   :  { %v1170_v45 = vmul.f32 0.044715, %v1168_v44 }
 0xdec   :  { %v1163_v46 = vpop.f32.mrf.mxu3 }
 0xded   :  { %v1172_v47 = vadd.f32 %v1170_v45, %v1161_v42  ;;  %v1164_v48 = vadd.f32 %v1480_v40, %v1163_v46 }
 0xdef   :  { %v1174_v49 = vmul.f32 0.7978846, %v1172_v47  ;;  %v1167_v51 = vmul.f32 %v1164_v48, %v1164_v48  ;;  %v1483_v47 = vld [vmem:[%s2136_s16 + $0x1] ss:$0 sm:$0xff] }
 0xdf1   :  { %1540 = vtanh.f32 %v1174_v49  ;;  %v1169_v52 = vmul.f32 %v1167_v51, %v1164_v48 }
 0xdf3   :  { %v1171_v53 = vmul.f32 0.044715, %v1169_v52 }
 0xdf5   :  { %v1173_v54 = vadd.f32 %v1171_v53, %v1164_v48  ;;  %v1327_v53 = vld [vmem:[%s2115_s19 + $0x18] sm:$0xff] }
 0xdf6   :  { %1347 = vmatpush.msrb.mxu2 %v1327_v53 }
 0xdf7   :  { %v1541_v56 = vpop.eup %1540  ;;  %v1175_v57 = vmul.f32 0.7978846, %v1173_v54  ;;  %v1326_v54 = vld [vmem:[%s2115_s19 + $0x10] sm:$0xff] }
 0xdf8   :  { %v1178_v59 = vadd.f32 1.0, %v1541_v56  ;;  %v1325_v56 = vld [vmem:[%s2115_s19 + $0x8] sm:$0xff]  ;;  %1348 = vmatpush.msrb.mxu2 %v1326_v54 }
 0xdf9   :  { %1542 = vtanh.f32 %v1175_v57  ;;  %v1324_v57 = vld [vmem:[%s2115_s19] sm:$0xff] }
 0xdfa   :  { %v1180_v61 = vmul.f32 0.5, %v1178_v59  ;;  %1349 = vmatpush.msrb.mxu2 %v1325_v56  ;;  %v1484_v59 = vld [vmem:[%s2114_s18] ss:$0 sm:$0xff] }
 0xdfc   :  { %v1182_v62 = vmul.f32 %v1180_v61, %v1161_v42  ;;  %1350 = vmatpush.msrb.mxu2 %v1324_v57 }
 0xdfe   :  { %1437 = vmatmul.msk.f32.vlgmr.msrb.gmra.mxu1 %vm625_vm1, %v1182_v62 }
 0xdff   :  { %v1543_v23 = vpop.eup %1542 }
 0xe00   :  { %v1179_v58 = vadd.f32 1.0, %v1543_v23 }
 0xe02   :  { %v1181_v63 = vmul.f32 0.5, %v1179_v58  ;;  %v1485_v58 = vld [vmem:[%s2116_s20] ss:$0 sm:$0xff] }
 0xe04   :  { %v1183_v14 = vmul.f32 %v1181_v63, %v1164_v48 }
 0xe06   :  { %1438 = vmatmul.msk.f32.gmra.mxu1 %vm625_vm1, %v1183_v14 }
 0xe7b   :  { %v1221_v60 = vpop.f32.mrf.mxu1 }
 0xe7c   :  { %v1222_v0 = vadd.f32 %v1481_v28, %v1221_v60 }
 0xe7e   :  { %v1227_v1 = vadd.f32 %v1222_v0, %v1125_v27 }
 0xe80   :  { %v1233_v2 = vsel %vm76_vm0, %v1227_v1, 0.0 }
 0xe81   :  { %1234 = vadd.xlane.f32.xlu1 %v1233_v2 }
 0xe83   :  { %v1224_v3 = vpop.f32.mrf.mxu1 }
 0xe84   :  { %v1225_v7 = vadd.f32 %v1481_v28, %v1224_v3 }
 0xe86   :  { %v1228_v4 = vadd.f32 %v1225_v7, %v1126_v50 }
 0xe88   :  { %v1236_v5 = vsel %vm76_vm0, %v1228_v4, 0.0 }
 0xe89   :  { %1237 = vadd.xlane.f32.xlu0 %v1236_v5 }
 0xef4   :  { %v1235_v6 = vpop.xlane.xlu1 %1234 }
 0xef5   :  { %v1239_v8 = vmul.f32 %v1235_v6, %v1705_v13 }
 0xef7   :  { %v1241_v9 = vsub.f32 %v1227_v1, %v1239_v8 }
 0xef9   :  { %v1243_v10 = vmul.f32 %v1241_v9, %v1241_v9 }
 0xefb   :  { %v1245_v11 = vsel %vm76_vm0, %v1243_v10, 0.0 }
 0xefc   :  { %1246 = vadd.xlane.f32.xlu0 %v1245_v11  ;;  %v1238_v12 = vpop.xlane.xlu0 %1237 }
 0xefd   :  { %v1240_v15 = vmul.f32 %v1238_v12, %v1705_v13 }
 0xeff   :  { %v1242_v16 = vsub.f32 %v1228_v4, %v1240_v15 }
 0xf01   :  { %v1244_v17 = vmul.f32 %v1242_v16, %v1242_v16 }
 0xf03   :  { %v1248_v18 = vsel %vm76_vm0, %v1244_v17, 0.0 }
 0xf04   :  { %1249 = vadd.xlane.f32.xlu2 %v1248_v18 }
 0xf6f   :  { %v1247_v19 = vpop.xlane.xlu0 %1246 }
 0xf70   :  { %v1251_v20 = vmul.f32 %v1247_v19, %v1705_v13 }
 0xf72   :  { %v1253_v24 = vadd.f32 1e-12, %v1251_v20 }
 0xf74   :  { %1544 = vrsqrt.f32 %v1253_v24  ;;  %vm1261_vm15 = vweird.f32 %v1253_v24 }
 0xf77   :  { %v1250_v27 = vpop.xlane.xlu2 %1249 }
 0xf78   :  { %v1252_v29 = vmul.f32 %v1250_v27, %v1705_v13  ;;  %v1482_v13 = vld [vmem:[%s2111_s15 + $0x1] ss:$0 sm:$0xff] }
 0xf7a   :  { %v1545_v30 = vpop.eup %1544  ;;  %v1254_v31 = vadd.f32 1e-12, %v1252_v29 }
 0xf7b   :  { %v1256_v32 = vmul.f32 %v1545_v30, %v1253_v24  ;;  %vm1262_vm14 = vweird.f32 %v1545_v30 }
 0xf7c   :  { %1546 = vrsqrt.f32 %v1254_v31  ;;  %vm1263_vm1 = vmor %vm1261_vm15, %vm1262_vm14  ;;  %vm1271_vm3 = vweird.f32 %v1254_v31 }
 0xf7d   :  { %v1257_v50 = vmul.f32 %v1545_v30, %v1256_v32 }
 0xf7f   :  { %v1258_v33 = vmul.f32 0.5, %v1257_v50 }
 0xf81   :  { %v1259_v34 = vsub.f32 1.5, %v1258_v33 }
 0xf82   :  { %v1547_v35 = vpop.eup %1546 }
 0xf83   :  { %v1266_v55 = vmul.f32 %v1547_v35, %v1254_v31  ;;  %v1260_v36 = vmul.f32 %v1545_v30, %v1259_v34  ;;  %vm1272_vm2 = vweird.f32 %v1547_v35 }
 0xf84   :  { %vm1273_vm4 = vmor %vm1271_vm3, %vm1272_vm2 }
 0xf85   :  { %v1267_v37 = vmul.f32 %v1547_v35, %v1266_v55  ;;  %v1264_v39 = vsel %vm1263_vm1, %v1545_v30, %v1260_v36 }
 0xf86   :  { %v1275_v42 = vmul.f32 %v1264_v39, %v1241_v9 }
 0xf87   :  { %v1268_v38 = vmul.f32 0.5, %v1267_v37 }
 0xf88   :  { %v1280_v45 = vmul.f32 %v1482_v13, %v1275_v42 }
 0xf89   :  { %v1269_v40 = vsub.f32 1.5, %v1268_v38 }
 0xf8a   :  { %v1285_v49 = vadd.f32 %v1483_v47, %v1280_v45 }
 0xf8b   :  { %v1270_v41 = vmul.f32 %v1547_v35, %v1269_v40 }
 0xf8d   :  { %v1274_v43 = vsel %vm1273_vm4, %v1547_v35, %v1270_v41 }
 0xf8e   :  { %v1276_v44 = vmul.f32 %v1274_v43, %v1242_v16 }
 0xf90   :  { %v1281_v46 = vmul.f32 %v1482_v13, %v1276_v44 }
 0xf92   :  { %v1286_v48 = vadd.f32 %v1483_v47, %v1281_v46 }
 0xf94   :  { %v1288_v51 = vrot.slane %v1286_v48, 7 }
 0xf96   :  { %v1291_v52 = vsel %vm1290_vm5, %v1285_v49, %v1288_v51 }
 0xf97   :  { %1441 = vmatmul.msk.f32.vlgmr.msra.gmra.mxu2 %vm76_vm0, %v1291_v52 }
0x101a   :  { %v1320_v61 = vpop.f32.mrf.mxu2 }
0x101b   :  { %v1321_v62 = vadd.f32 %v1484_v59, %v1320_v61 }
0x101d   :  { %1548 = vtanh.f32 %v1321_v62 }
0x1023   :  { %v1549_v23 = vpop.eup %1548 }
0x1024   :  { %1442 = vmatmul.msk.f32.vlgmr.msrb.gmra.mxu2 %vm76_vm0, %v1549_v23 }
0x10a7   :  { %v1352_v63 = vpop.f32.mrf.mxu2 }
0x10a8   :  { %v1353_v14 = vadd.f32 %v1485_v58, %v1352_v63 }
0x10aa   :  { %1356 = vst.msk [vmem:[#allocation2] sm:$0x3] %vm1355_vm6, %v1353_v14 }
0x10ab   :  { %1367 = dma.vmem_to_hbm [thread:$0]  %s1363_s12, 32, %s1365_s14, [#allocation3]  }
0x10ac   :  { %1574 = dma.done.wait [#allocation3], 32  }
0x10ad   :  { %1575 = vsyncadd [#allocation3], 4294967264 }
0x10ae   :  { %1372 = vsyncpa [#allocation3], 1 }

</bundles_post_ra>
